<compile_context>
chip_gen: v7x
topology: tpu7x:2x2x1
jax: 0.10.0
libtpu: 0.0.40
codegen_flags: <defaults>
</compile_context>

<pallas_src>
import functools

import jax
import jax.numpy as jnp
from jax import lax
from jax.experimental import pallas as pl
from jax.experimental.pallas import tpu as pltpu

EPS = 1e-5
_HIGH = lax.Precision.HIGHEST


# ---------------------------------------------------------------------------
# Pallas kernels
# ---------------------------------------------------------------------------
def bn_stats_kernel(x_ref, w_ref, b_ref, s_ref, q_ref):
    """Per grid step: accumulate per-channel sum / sum-of-squares of
    u = w @ x + b (1x1 conv, channels-first) over the sub-batch and the
    spatial (lane) axis.  Feeds the bn2 batch-statistics fold."""
    w = w_ref[...]
    b = b_ref[...]
    nb = x_ref.shape[0]
    co = w.shape[0]
    s = jnp.zeros((co, 1), jnp.float32)
    q = jnp.zeros((co, 1), jnp.float32)
    for i in range(nb):
        u = jnp.dot(w, x_ref[i], preferred_element_type=jnp.float32,
                    precision=_HIGH) + b
        s = s + jnp.sum(u, axis=1, keepdims=True)
        q = q + jnp.sum(u * u, axis=1, keepdims=True)
    s_ref[0] = s
    q_ref[0] = q


def main_kernel(xk_ref, w1_ref, b1_ref, s2_ref, t2_ref, wdw_ref, bdw_ref,
                u3_ref, pool_ref, s3_ref, g3_ref, *, L, Wo):
    """Per grid step (sub-batch of images):
      * group_conv1 (channel shuffle folded) on the MXU + bn2 + relu
      * depthwise 3x3 / stride 2 / pad 1 as a 9-tap VPU MAC over parity planes
      * relu(avg_pool2d(x, 3, stride=2, pad=1)) shortcut
      * bn4/bn6 statistics: per-channel sums of u3 and the cb x cb Gram of u3
        (accumulated in-kernel; only one tiny partial per grid step is stored).

    xk_ref holds the 4 stride-2 parity planes of each image concatenated along
    the lane axis: (nb, Cin, 4*L), L = Ho*Wo, so every 3x3/stride-2 tap is a
    statically shifted, masked slice in VMEM (no strided loads, no im2col,
    no concatenate temporaries)."""
    nb = xk_ref.shape[0]
    cb = w1_ref.shape[0]
    w1 = w1_ref[...]
    b1 = b1_ref[...]
    s2 = s2_ref[...]
    t2 = t2_ref[...]
    wdw = wdw_ref[...]                                 # (9, cb, 1), k = 3*kh + kw
    bdw = bdw_ref[...]

    # top/left zero-pad masks, built in-kernel (no DMA'd mask input)
    lane = lax.broadcasted_iota(jnp.int32, (1, L), 1)
    cmask = (lane % Wo != 0).astype(jnp.float32)       # kills out-col j == 0
    rmask = (lane >= Wo).astype(jnp.float32)           # kills out-row i == 0
    dmask = cmask * rmask

    def shifted(a, p, shift, mask):
        # parity plane p of `a`, shifted by `shift` lanes toward +, zero-filled
        # via mask (the few values pulled from the previous plane are exactly
        # the masked positions).  p >= 1 always, so the slice start is >= 0.
        return mask * a[:, p * L - shift:(p + 1) * L - shift]

    s3 = jnp.zeros((cb, 1), jnp.float32)
    g3 = jnp.zeros((cb, cb), jnp.float32)
    for b in range(nb):
        x = xk_ref[b]                                  # (cin, 4L)

        # stage 1: 1x1 grouped conv (shuffle folded) on the MXU + bn2 + relu
        u1 = jnp.dot(w1, x, preferred_element_type=jnp.float32,
                     precision=_HIGH) + b1             # (cb, 4L)
        y1 = jnp.maximum(u1 * s2 + t2, 0.0)

        ee = y1[:, 0 * L:1 * L]
        eo = y1[:, 1 * L:2 * L]
        oe = y1[:, 2 * L:3 * L]
        oo = y1[:, 3 * L:4 * L]

        # depthwise 3x3 / stride 2 / pad 1: 9-tap VPU MAC over shifted planes
        u3 = (wdw[4] * ee
              + wdw[5] * eo + wdw[3] * shifted(y1, 1, 1, cmask)
              + wdw[7] * oe + wdw[1] * shifted(y1, 2, Wo, rmask)
              + wdw[8] * oo + wdw[6] * shifted(y1, 3, 1, cmask)
              + wdw[2] * shifted(y1, 3, Wo, rmask)
              + wdw[0] * shifted(y1, 3, Wo + 1, dmask)
              + bdw)

        # avg_pool2d(x, 3, stride=2, padding=1, count_include_pad=True) shortcut
        xee = x[:, 0 * L:1 * L]
        xeo = x[:, 1 * L:2 * L]
        xoe = x[:, 2 * L:3 * L]
        xoo = x[:, 3 * L:4 * L]
        pool = (xee
                + xeo + shifted(x, 1, 1, cmask)
                + xoe + shifted(x, 2, Wo, rmask)
                + xoo + shifted(x, 3, 1, cmask)
                + shifted(x, 3, Wo, rmask)
                + shifted(x, 3, Wo + 1, dmask)) * (1.0 / 9.0)

        u3_ref[b] = u3
        pool_ref[b] = jnp.maximum(pool, 0.0)           # final relu on shortcut half

        # bn4 / bn6 statistics: channel sums + cb x cb Gram of u3 (MXU, NT form)
        s3 = s3 + jnp.sum(u3, axis=1, keepdims=True)
        g3 = g3 + lax.dot_general(u3, u3, (((1,), (1,)), ((), ())),
                                  preferred_element_type=jnp.float32,
                                  precision=_HIGH)

    s3_ref[0] = s3
    g3_ref[0] = g3


def final_kernel(u3_ref, pool_ref, a2_ref, c2_ref, out_ref):
    """branch = relu(bn6(group_conv5(bn4(u3)))) with bn4/conv5/bn6 folded into
    one affine map (a2, c2); written together with the pooled shortcut as a
    single (cin + oc, L) output block (no XLA concatenate afterwards)."""
    a2 = a2_ref[...]
    c2 = c2_ref[...]
    for b in range(u3_ref.shape[0]):
        branch = jnp.dot(a2, u3_ref[b], preferred_element_type=jnp.float32,
                         precision=_HIGH) + c2
        out_ref[b] = jnp.concatenate(
            [pool_ref[b], jnp.maximum(branch, 0.0)], axis=0)


# ---------------------------------------------------------------------------
# pallas_call plumbing
# ---------------------------------------------------------------------------
def _const_spec(shape):
    nd = len(shape)
    return pl.BlockSpec(shape, lambda i, nd=nd: (0,) * nd)


_CPARAMS = pltpu.CompilerParams(
    dimension_semantics=("parallel",),        # v7x: shard batch over both TCs
    vmem_limit_bytes=32 * 1024 * 1024,        # safe on v7x's 64 MiB; v6e can raise
)


def _bn_fold(s, q, count, gamma, beta):
    """Batch-stats BN -> per-channel (scale, shift): y = scale*x + shift."""
    m = s / count
    var = q / count - m * m
    scale = gamma * lax.rsqrt(var + EPS)
    return scale, beta - m * scale


@jax.jit
def shufflenet_unit_b_pallas(x_nchw, p):
    n, cin, h, w = x_nchw.shape
    assert h % 2 == 0 and w % 2 == 0, "stride-2 unit expects even spatial dims"
    ho, wo = h // 2, w // 2
    L = ho * wo
    cb = p['w1'].shape[0]
    oc = p['w5'].shape[0]
    x = x_nchw.astype(jnp.float32)

    # sub-batch per grid step: as many images as possible while keeping >= 2
    # grid steps (so ("parallel",) still shards across v7x's 2 TensorCores).
    nb = 1
    for cand in range(n // 2, 0, -1):
        if n % cand == 0:
            nb = cand
            break
    g = n // nb

    # ---- pass 1: bn2 batch statistics of conv1(x); uses the plain (C, H*W)
    # layout so the parity transpose below is NOT on this pass's critical path.
    x_hw = x.reshape(n, cin, h * w)
    s1p, q1p = pl.pallas_call(
        bn_stats_kernel,
        out_shape=(jax.ShapeDtypeStruct((g, cb, 1), jnp.float32),
                   jax.ShapeDtypeStruct((g, cb, 1), jnp.float32)),
        grid=(g,),
        in_specs=[pl.BlockSpec((nb, cin, h * w), lambda i: (i, 0, 0)),
                  _const_spec(p['w1'].shape), _const_spec(p['b1'].shape)],
        out_specs=(pl.BlockSpec((1, cb, 1), lambda i: (i, 0, 0)),
                   pl.BlockSpec((1, cb, 1), lambda i: (i, 0, 0))),
        compiler_params=_CPARAMS,
    )(x_hw, p['w1'], p['b1'])
    s2, t2 = _bn_fold(jnp.sum(s1p[..., 0], axis=0), jnp.sum(q1p[..., 0], axis=0),
                      n * h * w, p['g2'], p['be2'])

    # parity (space-to-depth) layout: (N, Cin, 4*L), lanes = [ee|eo|oe|oo] planes
    xk = x.reshape(n, cin, ho, 2, wo, 2).transpose(0, 1, 3, 5, 2, 4)
    xk = xk.reshape(n, cin, 4 * L)

    # ---- pass 2: conv1+bn2+relu -> depthwise 3x3/s2 + pool shortcut,
    # plus bn4/bn6 statistics (channel sums + cb x cb Gram of u3).
    kern = functools.partial(main_kernel, L=L, Wo=wo)
    u3, pool, s3p, g3p = pl.pallas_call(
        kern,
        out_shape=(jax.ShapeDtypeStruct((n, cb, L), jnp.float32),
                   jax.ShapeDtypeStruct((n, cin, L), jnp.float32),
                   jax.ShapeDtypeStruct((g, cb, 1), jnp.float32),
                   jax.ShapeDtypeStruct((g, cb, cb), jnp.float32)),
        grid=(g,),
        in_specs=[pl.BlockSpec((nb, cin, 4 * L), lambda i: (i, 0, 0)),
                  _const_spec(p['w1'].shape), _const_spec(p['b1'].shape),
                  _const_spec((cb, 1)), _const_spec((cb, 1)),
                  _const_spec(p['wdw9'].shape), _const_spec(p['bdw'].shape)],
        out_specs=(pl.BlockSpec((nb, cb, L), lambda i: (i, 0, 0)),
                   pl.BlockSpec((nb, cin, L), lambda i: (i, 0, 0)),
                   pl.BlockSpec((1, cb, 1), lambda i: (i, 0, 0)),
                   pl.BlockSpec((1, cb, cb), lambda i: (i, 0, 0))),
        compiler_params=_CPARAMS,
    )(xk, p['w1'], p['b1'], s2[:, None], t2[:, None], p['wdw9'], p['bdw'])

    # ---- fold bn4 + group_conv5 + bn6 into one affine map on u3.  bn6 batch
    # statistics come analytically from (s3, G3): for v = a@u3 + c,
    #   sum(v)  = a@s3 + count*c
    #   sum(v2) = diag(a G3 a^T) + 2 c (a@s3) + count*c^2
    count = n * L
    s3 = jnp.sum(s3p[..., 0], axis=0)                  # (cb,)
    g3 = jnp.sum(g3p, axis=0)                          # (cb, cb)
    q3 = jnp.diagonal(g3)                              # per-channel sumsq of u3
    s4, t4 = _bn_fold(s3, q3, count, p['g4'], p['b4'])
    a = p['w5'] * s4[None, :]                          # (oc, cb)
    c = p['w5'] @ t4 + p['b5']                         # (oc,)
    a_s3 = a @ s3
    sum_v = a_s3 + count * c
    sumsq_v = jnp.einsum('oc,cd,od->o', a, g3, a) + 2.0 * c * a_s3 + count * c * c
    s6, t6 = _bn_fold(sum_v, sumsq_v, count, p['g6'], p['b6'])
    a2 = s6[:, None] * a
    c2 = (s6 * c + t6)[:, None]

    # ---- pass 3: branch 1x1 conv (folded bn4/conv5/bn6) + relu, fused with the
    # shortcut into a single (N, Cin+Oc, L) output (no XLA concatenate).
    out = pl.pallas_call(
        final_kernel,
        out_shape=jax.ShapeDtypeStruct((n, cin + oc, L), jnp.float32),
        grid=(g,),
        in_specs=[pl.BlockSpec((nb, cb, L), lambda i: (i, 0, 0)),
                  pl.BlockSpec((nb, cin, L), lambda i: (i, 0, 0)),
                  _const_spec(a2.shape), _const_spec(c2.shape)],
        out_specs=pl.BlockSpec((nb, cin + oc, L), lambda i: (i, 0, 0)),
        compiler_params=_CPARAMS,
    )(u3, pool, a2, c2)

    # layout is already (N, C, Ho*Wo) -> NCHW by reshape only
    return out.reshape(n, cin + oc, ho, wo)


# ---------------------------------------------------------------------------
# Parameter construction / folding
# ---------------------------------------------------------------------------
def block_diag_dense(wg, groups):
    """(Cout, Cin//groups, 1, 1) grouped 1x1 conv weight -> dense (Cout, Cin)."""
    cout, cin_g = wg.shape[0], wg.shape[1]
    cout_g = cout // groups
    full = jnp.zeros((cout, cin_g * groups), jnp.float32)
    for g in range(groups):
        blk = wg[g * cout_g:(g + 1) * cout_g, :, 0, 0]
        full = full.at[g * cout_g:(g + 1) * cout_g,
                       g * cin_g:(g + 1) * cin_g].set(blk)
    return full


def make_params(key, in_channels, out_channels, groups=3):
    oc = out_channels - in_channels
    cb = oc // 4
    ks = jax.random.split(key, 12)
    f = jnp.float32
    raw = dict(
        w1=0.3 * jax.random.normal(ks[0], (cb, in_channels // groups, 1, 1), f),
        b1=0.1 * jax.random.normal(ks[1], (cb,), f),
        g2=1.0 + 0.1 * jax.random.normal(ks[2], (cb,), f),
        be2=0.1 * jax.random.normal(ks[3], (cb,), f),
        wdw=0.3 * jax.random.normal(ks[4], (cb, 1, 3, 3), f),
        bdw=0.1 * jax.random.normal(ks[5], (cb,), f),
        g4=1.0 + 0.1 * jax.random.normal(ks[6], (cb,), f),
        b4=0.1 * jax.random.normal(ks[7], (cb,), f),
        w5=0.3 * jax.random.normal(ks[8], (oc, cb // groups, 1, 1), f),
        b5=0.1 * jax.random.normal(ks[9], (oc,), f),
        g6=1.0 + 0.1 * jax.random.normal(ks[10], (oc,), f),
        b6=0.1 * jax.random.normal(ks[11], (oc,), f),
    )
    # fold the channel shuffle into the stage-1 output channels (a permutation
    # of conv1's output channels and of the bn2 parameters)
    cpg = cb // groups
    perm = jnp.array([(j % groups) * cpg + j // groups for j in range(cb)],
                     jnp.int32)
    kparams = dict(
        w1=block_diag_dense(raw['w1'], groups)[perm, :],          # (cb, cin)
        b1=raw['b1'][perm][:, None],                              # (cb, 1)
        g2=raw['g2'][perm], be2=raw['be2'][perm],                 # (cb,)
        wdw9=jnp.transpose(raw['wdw'][:, 0], (1, 2, 0)).reshape(9, cb)[:, :, None],
        bdw=raw['bdw'][:, None],                                  # (cb, 1)
        g4=raw['g4'], b4=raw['b4'],
        w5=block_diag_dense(raw['w5'], groups),                   # (oc, cb)
        b5=raw['b5'], g6=raw['g6'], b6=raw['b6'],
    )
    return raw, kparams


# ---------------------------------------------------------------------------
# Pure-JAX reference (independent code path) for validation
# ---------------------------------------------------------------------------
def shufflenet_unit_b_ref(x, r, groups=3):
    def bn(t, gamma, beta):
        mean = jnp.mean(t, axis=(0, 2, 3), keepdims=True)
        var = jnp.mean(jnp.square(t), axis=(0, 2, 3), keepdims=True) - jnp.square(mean)
        return ((t - mean) * lax.rsqrt(var + EPS) * gamma[None, :, None, None]
                + beta[None, :, None, None])

    def conv(t, wgt, b, stride, padding, fgc):
        y = lax.conv_general_dilated(
            t, wgt, window_strides=(stride, stride), padding=padding,
            feature_group_count=fgc,
            dimension_numbers=('NCHW', 'OIHW', 'NCHW'),
            precision=lax.Precision.HIGHEST)
        return y + b[None, :, None, None]

    out = conv(x, r['w1'], r['b1'], 1, 'VALID', groups)
    out = jax.nn.relu(bn(out, r['g2'], r['be2']))
    n, c, h, w = out.shape
    out = out.reshape(n, groups, c // groups, h, w).transpose(0, 2, 1, 3, 4)
    out = out.reshape(n, c, h, w)                         # channel shuffle
    out = conv(out, r['wdw'], r['bdw'], 2, ((1, 1), (1, 1)), c)
    out = bn(out, r['g4'], r['b4'])
    out = conv(out, r['w5'], r['b5'], 1, 'VALID', groups)
    out = bn(out, r['g6'], r['b6'])
    xpool = lax.reduce_window(x, 0.0, lax.add, (1, 1, 3, 3), (1, 1, 2, 2),
                              ((0, 0), (0, 0), (1, 1), (1, 1))) / 9.0
    return jax.nn.relu(jnp.concatenate([xpool, out], axis=1))


if __name__ == "__main__":
    key = jax.random.PRNGKey(0)
    N, CIN, H, W = 2, 6, 16, 16
    OUT_CHANNELS, GROUPS = 30, 3            # -> branch channels 24, bottleneck 6

    kx, kp = jax.random.split(key)
    x = jax.random.uniform(kx, (N, CIN, H, W), jnp.float32)
    raw, kparams = make_params(kp, CIN, OUT_CHANNELS, GROUPS)

    out = jax.block_until_ready(shufflenet_unit_b_pallas(x, kparams))
    assert out.shape == (N, OUT_CHANNELS, H // 2, W // 2), out.shape

    ref = shufflenet_unit_b_ref(x, raw, GROUPS)
    err = float(jnp.max(jnp.abs(out - ref)))
    if not bool(jnp.allclose(out, ref, atol=1e-2, rtol=1e-2)):
        raise AssertionError(f"Pallas vs reference mismatch, max abs err = {err}")
    print("KERNEL_OK")
</pallas_src>

<mosaic_0001>
module attributes {stable_mosaic.version = 11 : i64} {
  func.func @bn_stats_kernel(%arg0: i32, %arg1: memref<1x6x256xf32, #tpu.memory_space<vmem>>, %arg2: memref<6x6xf32, #tpu.memory_space<vmem>>, %arg3: memref<6x1xf32, #tpu.memory_space<vmem>>, %arg4: memref<1x6x1xf32, #tpu.memory_space<vmem>>, %arg5: memref<1x6x1xf32, #tpu.memory_space<vmem>>) attributes {dimension_semantics = [#tpu.dimension_semantics<parallel>], iteration_bounds = array<i64: 2>, scalar_prefetch = 0 : i64, scratch_operands = 0 : i64, tpu.core_type = #tpu.core_type<tc>, window_params = [{transform_indices = @transform_0, window_bounds = array<i64: 1, 6, 256>}, {pipeline_mode = #tpu.pipeline_mode<synchronous>, transform_indices = @transform_1, window_bounds = array<i64: 6, 6>}, {pipeline_mode = #tpu.pipeline_mode<synchronous>, transform_indices = @transform_2, window_bounds = array<i64: 6, 1>}, {transform_indices = @transform_3, window_bounds = array<i64: 1, 6, 1>}, {transform_indices = @transform_4, window_bounds = array<i64: 1, 6, 1>}]} {
    %c0 = arith.constant 0 : index
    %c0_0 = arith.constant 0 : index
    %0 = vector.load %arg2[%c0, %c0_0] : memref<6x6xf32, #tpu.memory_space<vmem>>, vector<6x6xf32>
    %c0_1 = arith.constant 0 : index
    %c0_2 = arith.constant 0 : index
    %1 = vector.load %arg3[%c0_1, %c0_2] : memref<6x1xf32, #tpu.memory_space<vmem>>, vector<6x1xf32>
    %cst = arith.constant 0.000000e+00 : f32
    %2 = vector.broadcast %cst : f32 to vector<6x1xf32>
    %cst_3 = arith.constant 0.000000e+00 : f32
    %3 = vector.broadcast %cst_3 : f32 to vector<6x1xf32>
    %c0_4 = arith.constant 0 : index
    %c0_5 = arith.constant 0 : index
    %c0_6 = arith.constant 0 : index
    %4 = vector.load %arg1[%c0_4, %c0_5, %c0_6] : memref<1x6x256xf32, #tpu.memory_space<vmem>>, vector<1x6x256xf32>
    %5 = vector.shape_cast %4 : vector<1x6x256xf32> to vector<6x256xf32>
    %cst_7 = arith.constant dense<0.000000e+00> : vector<6x256xf32>
    %6 = tpu.matmul %0, %5, %cst_7 {dimension_numbers = #tpu.dot_dimension_numbers<[1], [0], [0], [1], [0, 0, 1, 1], [], []>, precision = #tpu.contract_precision<fp32>} : vector<6x6xf32>, vector<6x256xf32>, vector<6x256xf32> -> vector<6x256xf32>
    %7 = vector.broadcast %1 : vector<6x1xf32> to vector<6x256xf32>
    %8 = arith.addf %6, %7 : vector<6x256xf32>
    %cst_8 = arith.constant dense<0.000000e+00> : vector<6xf32>
    %9 = vector.multi_reduction <add>, %8, %cst_8 [1] : vector<6x256xf32> to vector<6xf32>
    %10 = vector.shape_cast %9 : vector<6xf32> to vector<6x1xf32>
    %11 = arith.addf %2, %10 : vector<6x1xf32>
    %12 = arith.mulf %8, %8 : vector<6x256xf32>
    %cst_9 = arith.constant dense<0.000000e+00> : vector<6xf32>
    %13 = vector.multi_reduction <add>, %12, %cst_9 [1] : vector<6x256xf32> to vector<6xf32>
    %14 = vector.shape_cast %13 : vector<6xf32> to vector<6x1xf32>
    %15 = arith.addf %3, %14 : vector<6x1xf32>
    %c0_10 = arith.constant 0 : index
    %c0_11 = arith.constant 0 : index
    %c0_12 = arith.constant 0 : index
    %16 = vector.load %arg4[%c0_10, %c0_11, %c0_12] : memref<1x6x1xf32, #tpu.memory_space<vmem>>, vector<1x6x1xf32>
    %17 = vector.shape_cast %16 : vector<1x6x1xf32> to vector<6x1xf32>
    %18 = vector.shape_cast %11 : vector<6x1xf32> to vector<1x6x1xf32>
    tpu.vector_store %arg4[%c0_10, %c0_11, %c0_12], %18 {strides = array<i32>} : memref<1x6x1xf32, #tpu.memory_space<vmem>>, vector<1x6x1xf32>,
    %c0_13 = arith.constant 0 : index
    %c0_14 = arith.constant 0 : index
    %c0_15 = arith.constant 0 : index
    %19 = vector.load %arg5[%c0_13, %c0_14, %c0_15] : memref<1x6x1xf32, #tpu.memory_space<vmem>>, vector<1x6x1xf32>
    %20 = vector.shape_cast %19 : vector<1x6x1xf32> to vector<6x1xf32>
    %21 = vector.shape_cast %15 : vector<6x1xf32> to vector<1x6x1xf32>
    tpu.vector_store %arg5[%c0_13, %c0_14, %c0_15], %21 {strides = array<i32>} : memref<1x6x1xf32, #tpu.memory_space<vmem>>, vector<1x6x1xf32>,
    return
  }
  func.func @transform_0(%arg0: i32) -> (i32, i32, i32) {
    %c0_i32 = arith.constant 0 : i32
    %c0_i32_0 = arith.constant 0 : i32
    %c0_i32_1 = arith.constant 0 : i32
    return %arg0, %c0_i32, %c0_i32_0 : i32, i32, i32
  }
  func.func @transform_1(%arg0: i32) -> (i32, i32) {
    %c0_i32 = arith.constant 0 : i32
    %c0_i32_0 = arith.constant 0 : i32
    %c0_i32_1 = arith.constant 0 : i32
    return %c0_i32, %c0_i32_0 : i32, i32
  }
  func.func @transform_2(%arg0: i32) -> (i32, i32) {
    %c0_i32 = arith.constant 0 : i32
    %c0_i32_0 = arith.constant 0 : i32
    %c0_i32_1 = arith.constant 0 : i32
    return %c0_i32, %c0_i32_0 : i32, i32
  }
  func.func @transform_3(%arg0: i32) -> (i32, i32, i32) {
    %c0_i32 = arith.constant 0 : i32
    %c0_i32_0 = arith.constant 0 : i32
    %c0_i32_1 = arith.constant 0 : i32
    return %arg0, %c0_i32, %c0_i32_0 : i32, i32, i32
  }
  func.func @transform_4(%arg0: i32) -> (i32, i32, i32) {
    %c0_i32 = arith.constant 0 : i32
    %c0_i32_0 = arith.constant 0 : i32
    %c0_i32_1 = arith.constant 0 : i32
    return %arg0, %c0_i32, %c0_i32_0 : i32, i32, i32
  }
}

module attributes {stable_mosaic.version = 11 : i64} {
  func.func @main_kernel(%arg0: i32, %arg1: memref<1x6x256xf32, #tpu.memory_space<vmem>>, %arg2: memref<6x6xf32, #tpu.memory_space<vmem>>, %arg3: memref<6x1xf32, #tpu.memory_space<vmem>>, %arg4: memref<6x1xf32, #tpu.memory_space<vmem>>, %arg5: memref<6x1xf32, #tpu.memory_space<vmem>>, %arg6: memref<9x6x1xf32, #tpu.memory_space<vmem>>, %arg7: memref<6x1xf32, #tpu.memory_space<vmem>>, %arg8: memref<1x6x64xf32, #tpu.memory_space<vmem>>, %arg9: memref<1x6x64xf32, #tpu.memory_space<vmem>>, %arg10: memref<1x6x1xf32, #tpu.memory_space<vmem>>, %arg11: memref<1x6x6xf32, #tpu.memory_space<vmem>>) attributes {dimension_semantics = [#tpu.dimension_semantics<parallel>], iteration_bounds = array<i64: 2>, scalar_prefetch = 0 : i64, scratch_operands = 0 : i64, tpu.core_type = #tpu.core_type<tc>, window_params = [{transform_indices = @transform_0, window_bounds = array<i64: 1, 6, 256>}, {pipeline_mode = #tpu.pipeline_mode<synchronous>, transform_indices = @transform_1, window_bounds = array<i64: 6, 6>}, {pipeline_mode = #tpu.pipeline_mode<synchronous>, transform_indices = @transform_2, window_bounds = array<i64: 6, 1>}, {pipeline_mode = #tpu.pipeline_mode<synchronous>, transform_indices = @transform_3, window_bounds = array<i64: 6, 1>}, {pipeline_mode = #tpu.pipeline_mode<synchronous>, transform_indices = @transform_4, window_bounds = array<i64: 6, 1>}, {pipeline_mode = #tpu.pipeline_mode<synchronous>, transform_indices = @transform_5, window_bounds = array<i64: 9, 6, 1>}, {pipeline_mode = #tpu.pipeline_mode<synchronous>, transform_indices = @transform_6, window_bounds = array<i64: 6, 1>}, {transform_indices = @transform_7, window_bounds = array<i64: 1, 6, 64>}, {transform_indices = @transform_8, window_bounds = array<i64: 1, 6, 64>}, {transform_indices = @transform_9, window_bounds = array<i64: 1, 6, 1>}, {transform_indices = @transform_10, window_bounds = array<i64: 1, 6, 6>}]} {
    %c0 = arith.constant 0 : index
    %c0_0 = arith.constant 0 : index
    %0 = vector.load %arg2[%c0, %c0_0] : memref<6x6xf32, #tpu.memory_space<vmem>>, vector<6x6xf32>
    %c0_1 = arith.constant 0 : index
    %c0_2 = arith.constant 0 : index
    %1 = vector.load %arg3[%c0_1, %c0_2] : memref<6x1xf32, #tpu.memory_space<vmem>>, vector<6x1xf32>
    %c0_3 = arith.constant 0 : index
    %c0_4 = arith.constant 0 : index
    %2 = vector.load %arg4[%c0_3, %c0_4] : memref<6x1xf32, #tpu.memory_space<vmem>>, vector<6x1xf32>
    %c0_5 = arith.constant 0 : index
    %c0_6 = arith.constant 0 : index
    %3 = vector.load %arg5[%c0_5, %c0_6] : memref<6x1xf32, #tpu.memory_space<vmem>>, vector<6x1xf32>
    %c0_7 = arith.constant 0 : index
    %c0_8 = arith.constant 0 : index
    %c0_9 = arith.constant 0 : index
    %4 = vector.load %arg6[%c0_7, %c0_8, %c0_9] : memref<9x6x1xf32, #tpu.memory_space<vmem>>, vector<9x6x1xf32>
    %c0_10 = arith.constant 0 : index
    %c0_11 = arith.constant 0 : index
    %5 = vector.load %arg7[%c0_10, %c0_11] : memref<6x1xf32, #tpu.memory_space<vmem>>, vector<6x1xf32>
    %6 = tpu.iota {dimensions = array<i32: 1>} : vector<1x64xi32>
    %c8_i32 = arith.constant 8 : i32
    %c0_i32 = arith.constant 0 : i32
    %7 = arith.cmpi eq, %c8_i32, %c0_i32 : i32
    %c1_i32 = arith.constant 1 : i32
    %8 = arith.select %7, %c1_i32, %c8_i32 : i32
    %9 = vector.broadcast %8 : i32 to vector<1x64xi32>
    %10 = arith.remsi %6, %9 : vector<1x64xi32>
    %c0_i32_12 = arith.constant 0 : i32
    %11 = vector.broadcast %c0_i32_12 : i32 to vector<1x64xi32>
    %12 = arith.cmpi ne, %10, %11 : vector<1x64xi32>
    %c0_i32_13 = arith.constant 0 : i32
    %13 = vector.broadcast %c0_i32_13 : i32 to vector<1x64xi32>
    %14 = arith.cmpi slt, %10, %13 : vector<1x64xi32>
    %c0_i32_14 = arith.constant 0 : i32
    %15 = arith.cmpi slt, %8, %c0_i32_14 : i32
    %16 = vector.broadcast %15 : i1 to vector<1x64xi1>
    %17 = vector.broadcast %16 : vector<1x64xi1> to vector<1x64xi1>
    %18 = arith.xori %14, %17 : vector<1x64xi1>
    %19 = arith.andi %18, %12 : vector<1x64xi1>
    %20 = vector.broadcast %8 : i32 to vector<1x64xi32>
    %21 = arith.addi %10, %20 : vector<1x64xi32>
    %22 = arith.select %19, %21, %10 : vector<1x64xi1>, vector<1x64xi32>
    %c0_i32_15 = arith.constant 0 : i32
    %23 = vector.broadcast %c0_i32_15 : i32 to vector<1x64xi32>
    %24 = arith.cmpi ne, %22, %23 : vector<1x64xi32>
    %25 = arith.extui %24 : vector<1x64xi1> to vector<1x64xi32>
    %26 = arith.sitofp %25 : vector<1x64xi32> to vector<1x64xf32>
    %c8_i32_16 = arith.constant 8 : i32
    %27 = vector.broadcast %c8_i32_16 : i32 to vector<1x64xi32>
    %28 = arith.cmpi sge, %6, %27 : vector<1x64xi32>
    %29 = arith.extui %28 : vector<1x64xi1> to vector<1x64xi32>
    %30 = arith.sitofp %29 : vector<1x64xi32> to vector<1x64xf32>
    %31 = arith.mulf %26, %30 : vector<1x64xf32>
    %cst = arith.constant 0.000000e+00 : f32
    %32 = vector.broadcast %cst : f32 to vector<6x1xf32>
    %cst_17 = arith.constant 0.000000e+00 : f32
    %33 = vector.broadcast %cst_17 : f32 to vector<6x6xf32>
    %c0_18 = arith.constant 0 : index
    %c0_19 = arith.constant 0 : index
    %c0_20 = arith.constant 0 : index
    %34 = vector.load %arg1[%c0_18, %c0_19, %c0_20] : memref<1x6x256xf32, #tpu.memory_space<vmem>>, vector<1x6x256xf32>
    %35 = vector.shape_cast %34 : vector<1x6x256xf32> to vector<6x256xf32>
    %cst_21 = arith.constant dense<0.000000e+00> : vector<6x256xf32>
    %36 = tpu.matmul %0, %35, %cst_21 {dimension_numbers = #tpu.dot_dimension_numbers<[1], [0], [0], [1], [0, 0, 1, 1], [], []>, precision = #tpu.contract_precision<fp32>} : vector<6x6xf32>, vector<6x256xf32>, vector<6x256xf32> -> vector<6x256xf32>
    %37 = vector.broadcast %1 : vector<6x1xf32> to vector<6x256xf32>
    %38 = arith.addf %36, %37 : vector<6x256xf32>
    %39 = vector.broadcast %2 : vector<6x1xf32> to vector<6x256xf32>
    %40 = arith.mulf %38, %39 : vector<6x256xf32>
    %41 = vector.broadcast %3 : vector<6x1xf32> to vector<6x256xf32>
    %42 = arith.addf %40, %41 : vector<6x256xf32>
    %cst_22 = arith.constant 0.000000e+00 : f32
    %43 = vector.broadcast %cst_22 : f32 to vector<6x256xf32>
    %44 = arith.maximumf %42, %43 : vector<6x256xf32>
    %45 = vector.extract_strided_slice %44 {offsets = [0, 0], sizes = [6, 64], strides = [1, 1]} : vector<6x256xf32> to vector<6x64xf32>
    %46 = vector.extract_strided_slice %44 {offsets = [0, 64], sizes = [6, 64], strides = [1, 1]} : vector<6x256xf32> to vector<6x64xf32>
    %47 = vector.extract_strided_slice %44 {offsets = [0, 128], sizes = [6, 64], strides = [1, 1]} : vector<6x256xf32> to vector<6x64xf32>
    %48 = vector.extract_strided_slice %44 {offsets = [0, 192], sizes = [6, 64], strides = [1, 1]} : vector<6x256xf32> to vector<6x64xf32>
    %49 = vector.extract_strided_slice %4 {offsets = [4, 0, 0], sizes = [1, 6, 1], strides = [1, 1, 1]} : vector<9x6x1xf32> to vector<1x6x1xf32>
    %50 = vector.shape_cast %49 : vector<1x6x1xf32> to vector<6x1xf32>
    %51 = vector.broadcast %50 : vector<6x1xf32> to vector<6x64xf32>
    %52 = arith.mulf %51, %45 : vector<6x64xf32>
    %53 = vector.extract_strided_slice %4 {offsets = [5, 0, 0], sizes = [1, 6, 1], strides = [1, 1, 1]} : vector<9x6x1xf32> to vector<1x6x1xf32>
    %54 = vector.shape_cast %53 : vector<1x6x1xf32> to vector<6x1xf32>
    %55 = vector.broadcast %54 : vector<6x1xf32> to vector<6x64xf32>
    %56 = arith.mulf %55, %46 : vector<6x64xf32>
    %57 = arith.addf %52, %56 : vector<6x64xf32>
    %58 = vector.extract_strided_slice %4 {offsets = [3, 0, 0], sizes = [1, 6, 1], strides = [1, 1, 1]} : vector<9x6x1xf32> to vector<1x6x1xf32>
    %59 = vector.shape_cast %58 : vector<1x6x1xf32> to vector<6x1xf32>
    %60 = vector.extract_strided_slice %44 {offsets = [0, 63], sizes = [6, 64], strides = [1, 1]} : vector<6x256xf32> to vector<6x64xf32>
    %61 = vector.broadcast %26 : vector<1x64xf32> to vector<6x64xf32>
    %62 = arith.mulf %61, %60 : vector<6x64xf32>
    %63 = vector.broadcast %59 : vector<6x1xf32> to vector<6x64xf32>
    %64 = arith.mulf %63, %62 : vector<6x64xf32>
    %65 = arith.addf %57, %64 : vector<6x64xf32>
    %66 = vector.extract_strided_slice %4 {offsets = [7, 0, 0], sizes = [1, 6, 1], strides = [1, 1, 1]} : vector<9x6x1xf32> to vector<1x6x1xf32>
    %67 = vector.shape_cast %66 : vector<1x6x1xf32> to vector<6x1xf32>
    %68 = vector.broadcast %67 : vector<6x1xf32> to vector<6x64xf32>
    %69 = arith.mulf %68, %47 : vector<6x64xf32>
    %70 = arith.addf %65, %69 : vector<6x64xf32>
    %71 = vector.extract_strided_slice %4 {offsets = [1, 0, 0], sizes = [1, 6, 1], strides = [1, 1, 1]} : vector<9x6x1xf32> to vector<1x6x1xf32>
    %72 = vector.shape_cast %71 : vector<1x6x1xf32> to vector<6x1xf32>
    %73 = vector.extract_strided_slice %44 {offsets = [0, 120], sizes = [6, 64], strides = [1, 1]} : vector<6x256xf32> to vector<6x64xf32>
    %74 = vector.broadcast %30 : vector<1x64xf32> to vector<6x64xf32>
    %75 = arith.mulf %74, %73 : vector<6x64xf32>
    %76 = vector.broadcast %72 : vector<6x1xf32> to vector<6x64xf32>
    %77 = arith.mulf %76, %75 : vector<6x64xf32>
    %78 = arith.addf %70, %77 : vector<6x64xf32>
    %79 = vector.extract_strided_slice %4 {offsets = [8, 0, 0], sizes = [1, 6, 1], strides = [1, 1, 1]} : vector<9x6x1xf32> to vector<1x6x1xf32>
    %80 = vector.shape_cast %79 : vector<1x6x1xf32> to vector<6x1xf32>
    %81 = vector.broadcast %80 : vector<6x1xf32> to vector<6x64xf32>
    %82 = arith.mulf %81, %48 : vector<6x64xf32>
    %83 = arith.addf %78, %82 : vector<6x64xf32>
    %84 = vector.extract_strided_slice %4 {offsets = [6, 0, 0], sizes = [1, 6, 1], strides = [1, 1, 1]} : vector<9x6x1xf32> to vector<1x6x1xf32>
    %85 = vector.shape_cast %84 : vector<1x6x1xf32> to vector<6x1xf32>
    %86 = vector.extract_strided_slice %44 {offsets = [0, 191], sizes = [6, 64], strides = [1, 1]} : vector<6x256xf32> to vector<6x64xf32>
    %87 = vector.broadcast %26 : vector<1x64xf32> to vector<6x64xf32>
    %88 = arith.mulf %87, %86 : vector<6x64xf32>
    %89 = vector.broadcast %85 : vector<6x1xf32> to vector<6x64xf32>
    %90 = arith.mulf %89, %88 : vector<6x64xf32>
    %91 = arith.addf %83, %90 : vector<6x64xf32>
    %92 = vector.extract_strided_slice %4 {offsets = [2, 0, 0], sizes = [1, 6, 1], strides = [1, 1, 1]} : vector<9x6x1xf32> to vector<1x6x1xf32>
    %93 = vector.shape_cast %92 : vector<1x6x1xf32> to vector<6x1xf32>
    %94 = vector.extract_strided_slice %44 {offsets = [0, 184], sizes = [6, 64], strides = [1, 1]} : vector<6x256xf32> to vector<6x64xf32>
    %95 = vector.broadcast %30 : vector<1x64xf32> to vector<6x64xf32>
    %96 = arith.mulf %95, %94 : vector<6x64xf32>
    %97 = vector.broadcast %93 : vector<6x1xf32> to vector<6x64xf32>
    %98 = arith.mulf %97, %96 : vector<6x64xf32>
    %99 = arith.addf %91, %98 : vector<6x64xf32>
    %100 = vector.extract_strided_slice %4 {offsets = [0, 0, 0], sizes = [1, 6, 1], strides = [1, 1, 1]} : vector<9x6x1xf32> to vector<1x6x1xf32>
    %101 = vector.shape_cast %100 : vector<1x6x1xf32> to vector<6x1xf32>
    %102 = vector.extract_strided_slice %44 {offsets = [0, 183], sizes = [6, 64], strides = [1, 1]} : vector<6x256xf32> to vector<6x64xf32>
    %103 = vector.broadcast %31 : vector<1x64xf32> to vector<6x64xf32>
    %104 = arith.mulf %103, %102 : vector<6x64xf32>
    %105 = vector.broadcast %101 : vector<6x1xf32> to vector<6x64xf32>
    %106 = arith.mulf %105, %104 : vector<6x64xf32>
    %107 = arith.addf %99, %106 : vector<6x64xf32>
    %108 = vector.broadcast %5 : vector<6x1xf32> to vector<6x64xf32>
    %109 = arith.addf %107, %108 : vector<6x64xf32>
    %110 = vector.extract_strided_slice %35 {offsets = [0, 0], sizes = [6, 64], strides = [1, 1]} : vector<6x256xf32> to vector<6x64xf32>
    %111 = vector.extract_strided_slice %35 {offsets = [0, 64], sizes = [6, 64], strides = [1, 1]} : vector<6x256xf32> to vector<6x64xf32>
    %112 = vector.extract_strided_slice %35 {offsets = [0, 128], sizes = [6, 64], strides = [1, 1]} : vector<6x256xf32> to vector<6x64xf32>
    %113 = vector.extract_strided_slice %35 {offsets = [0, 192], sizes = [6, 64], strides = [1, 1]} : vector<6x256xf32> to vector<6x64xf32>
    %114 = arith.addf %110, %111 : vector<6x64xf32>
    %115 = vector.extract_strided_slice %35 {offsets = [0, 63], sizes = [6, 64], strides = [1, 1]} : vector<6x256xf32> to vector<6x64xf32>
    %116 = vector.broadcast %26 : vector<1x64xf32> to vector<6x64xf32>
    %117 = arith.mulf %116, %115 : vector<6x64xf32>
    %118 = arith.addf %114, %117 : vector<6x64xf32>
    %119 = arith.addf %118, %112 : vector<6x64xf32>
    %120 = vector.extract_strided_slice %35 {offsets = [0, 120], sizes = [6, 64], strides = [1, 1]} : vector<6x256xf32> to vector<6x64xf32>
    %121 = vector.broadcast %30 : vector<1x64xf32> to vector<6x64xf32>
    %122 = arith.mulf %121, %120 : vector<6x64xf32>
    %123 = arith.addf %119, %122 : vector<6x64xf32>
    %124 = arith.addf %123, %113 : vector<6x64xf32>
    %125 = vector.extract_strided_slice %35 {offsets = [0, 191], sizes = [6, 64], strides = [1, 1]} : vector<6x256xf32> to vector<6x64xf32>
    %126 = vector.broadcast %26 : vector<1x64xf32> to vector<6x64xf32>
    %127 = arith.mulf %126, %125 : vector<6x64xf32>
    %128 = arith.addf %124, %127 : vector<6x64xf32>
    %129 = vector.extract_strided_slice %35 {offsets = [0, 184], sizes = [6, 64], strides = [1, 1]} : vector<6x256xf32> to vector<6x64xf32>
    %130 = vector.broadcast %30 : vector<1x64xf32> to vector<6x64xf32>
    %131 = arith.mulf %130, %129 : vector<6x64xf32>
    %132 = arith.addf %128, %131 : vector<6x64xf32>
    %133 = vector.extract_strided_slice %35 {offsets = [0, 183], sizes = [6, 64], strides = [1, 1]} : vector<6x256xf32> to vector<6x64xf32>
    %134 = vector.broadcast %31 : vector<1x64xf32> to vector<6x64xf32>
    %135 = arith.mulf %134, %133 : vector<6x64xf32>
    %136 = arith.addf %132, %135 : vector<6x64xf32>
    %cst_23 = arith.constant 0.111111112 : f32
    %137 = vector.broadcast %cst_23 : f32 to vector<6x64xf32>
    %138 = arith.mulf %136, %137 : vector<6x64xf32>
    %c0_24 = arith.constant 0 : index
    %c0_25 = arith.constant 0 : index
    %c0_26 = arith.constant 0 : index
    %139 = vector.load %arg8[%c0_24, %c0_25, %c0_26] : memref<1x6x64xf32, #tpu.memory_space<vmem>>, vector<1x6x64xf32>
    %140 = vector.shape_cast %139 : vector<1x6x64xf32> to vector<6x64xf32>
    %141 = vector.shape_cast %109 : vector<6x64xf32> to vector<1x6x64xf32>
    tpu.vector_store %arg8[%c0_24, %c0_25, %c0_26], %141 {strides = array<i32>} : memref<1x6x64xf32, #tpu.memory_space<vmem>>, vector<1x6x64xf32>,
    %cst_27 = arith.constant 0.000000e+00 : f32
    %142 = vector.broadcast %cst_27 : f32 to vector<6x64xf32>
    %143 = arith.maximumf %138, %142 : vector<6x64xf32>
    %c0_28 = arith.constant 0 : index
    %c0_29 = arith.constant 0 : index
    %c0_30 = arith.constant 0 : index
    %144 = vector.load %arg9[%c0_28, %c0_29, %c0_30] : memref<1x6x64xf32, #tpu.memory_space<vmem>>, vector<1x6x64xf32>
    %145 = vector.shape_cast %144 : vector<1x6x64xf32> to vector<6x64xf32>
    %146 = vector.shape_cast %143 : vector<6x64xf32> to vector<1x6x64xf32>
    tpu.vector_store %arg9[%c0_28, %c0_29, %c0_30], %146 {strides = array<i32>} : memref<1x6x64xf32, #tpu.memory_space<vmem>>, vector<1x6x64xf32>,
    %cst_31 = arith.constant dense<0.000000e+00> : vector<6xf32>
    %147 = vector.multi_reduction <add>, %109, %cst_31 [1] : vector<6x64xf32> to vector<6xf32>
    %148 = vector.shape_cast %147 : vector<6xf32> to vector<6x1xf32>
    %149 = arith.addf %32, %148 : vector<6x1xf32>
    %cst_32 = arith.constant dense<0.000000e+00> : vector<6x6xf32>
    %150 = tpu.matmul %109, %109, %cst_32 {dimension_numbers = #tpu.dot_dimension_numbers<[1], [1], [0], [0], [0, 0, 1, 0], [], []>, precision = #tpu.contract_precision<fp32>} : vector<6x64xf32>, vector<6x64xf32>, vector<6x6xf32> -> vector<6x6xf32>
    %151 = arith.addf %33, %150 : vector<6x6xf32>
    %c0_33 = arith.constant 0 : index
    %c0_34 = arith.constant 0 : index
    %c0_35 = arith.constant 0 : index
    %152 = vector.load %arg10[%c0_33, %c0_34, %c0_35] : memref<1x6x1xf32, #tpu.memory_space<vmem>>, vector<1x6x1xf32>
    %153 = vector.shape_cast %152 : vector<1x6x1xf32> to vector<6x1xf32>
    %154 = vector.shape_cast %149 : vector<6x1xf32> to vector<1x6x1xf32>
    tpu.vector_store %arg10[%c0_33, %c0_34, %c0_35], %154 {strides = array<i32>} : memref<1x6x1xf32, #tpu.memory_space<vmem>>, vector<1x6x1xf32>,
    %c0_36 = arith.constant 0 : index
    %c0_37 = arith.constant 0 : index
    %c0_38 = arith.constant 0 : index
    %155 = vector.load %arg11[%c0_36, %c0_37, %c0_38] : memref<1x6x6xf32, #tpu.memory_space<vmem>>, vector<1x6x6xf32>
    %156 = vector.shape_cast %155 : vector<1x6x6xf32> to vector<6x6xf32>
    %157 = vector.shape_cast %151 : vector<6x6xf32> to vector<1x6x6xf32>
    tpu.vector_store %arg11[%c0_36, %c0_37, %c0_38], %157 {strides = array<i32>} : memref<1x6x6xf32, #tpu.memory_space<vmem>>, vector<1x6x6xf32>,
    return
  }
  func.func @transform_0(%arg0: i32) -> (i32, i32, i32) {
    %c0_i32 = arith.constant 0 : i32
    %c0_i32_0 = arith.constant 0 : i32
    %c0_i32_1 = arith.constant 0 : i32
    return %arg0, %c0_i32, %c0_i32_0 : i32, i32, i32
  }
  func.func @transform_1(%arg0: i32) -> (i32, i32) {
    %c0_i32 = arith.constant 0 : i32
    %c0_i32_0 = arith.constant 0 : i32
    %c0_i32_1 = arith.constant 0 : i32
    return %c0_i32, %c0_i32_0 : i32, i32
  }
  func.func @transform_2(%arg0: i32) -> (i32, i32) {
    %c0_i32 = arith.constant 0 : i32
    %c0_i32_0 = arith.constant 0 : i32
    %c0_i32_1 = arith.constant 0 : i32
    return %c0_i32, %c0_i32_0 : i32, i32
  }
  func.func @transform_3(%arg0: i32) -> (i32, i32) {
    %c0_i32 = arith.constant 0 : i32
    %c0_i32_0 = arith.constant 0 : i32
    %c0_i32_1 = arith.constant 0 : i32
    return %c0_i32, %c0_i32_0 : i32, i32
  }
  func.func @transform_4(%arg0: i32) -> (i32, i32) {
    %c0_i32 = arith.constant 0 : i32
    %c0_i32_0 = arith.constant 0 : i32
    %c0_i32_1 = arith.constant 0 : i32
    return %c0_i32, %c0_i32_0 : i32, i32
  }
  func.func @transform_5(%arg0: i32) -> (i32, i32, i32) {
    %c0_i32 = arith.constant 0 : i32
    %c0_i32_0 = arith.constant 0 : i32
    %c0_i32_1 = arith.constant 0 : i32
    %c0_i32_2 = arith.constant 0 : i32
    return %c0_i32, %c0_i32_0, %c0_i32_1 : i32, i32, i32
  }
  func.func @transform_6(%arg0: i32) -> (i32, i32) {
    %c0_i32 = arith.constant 0 : i32
    %c0_i32_0 = arith.constant 0 : i32
    %c0_i32_1 = arith.constant 0 : i32
    return %c0_i32, %c0_i32_0 : i32, i32
  }
  func.func @transform_7(%arg0: i32) -> (i32, i32, i32) {
    %c0_i32 = arith.constant 0 : i32
    %c0_i32_0 = arith.constant 0 : i32
    %c0_i32_1 = arith.constant 0 : i32
    return %arg0, %c0_i32, %c0_i32_0 : i32, i32, i32
  }
  func.func @transform_8(%arg0: i32) -> (i32, i32, i32) {
    %c0_i32 = arith.constant 0 : i32
    %c0_i32_0 = arith.constant 0 : i32
    %c0_i32_1 = arith.constant 0 : i32
    return %arg0, %c0_i32, %c0_i32_0 : i32, i32, i32
  }
  func.func @transform_9(%arg0: i32) -> (i32, i32, i32) {
    %c0_i32 = arith.constant 0 : i32
    %c0_i32_0 = arith.constant 0 : i32
    %c0_i32_1 = arith.constant 0 : i32
    return %arg0, %c0_i32, %c0_i32_0 : i32, i32, i32
  }
  func.func @transform_10(%arg0: i32) -> (i32, i32, i32) {
    %c0_i32 = arith.constant 0 : i32
    %c0_i32_0 = arith.constant 0 : i32
    %c0_i32_1 = arith.constant 0 : i32
    return %arg0, %c0_i32, %c0_i32_0 : i32, i32, i32
  }
}

module attributes {stable_mosaic.version = 11 : i64} {
  func.func @final_kernel(%arg0: i32, %arg1: memref<1x6x64xf32, #tpu.memory_space<vmem>>, %arg2: memref<1x6x64xf32, #tpu.memory_space<vmem>>, %arg3: memref<24x6xf32, #tpu.memory_space<vmem>>, %arg4: memref<24x1xf32, #tpu.memory_space<vmem>>, %arg5: memref<1x30x64xf32, #tpu.memory_space<vmem>>) attributes {dimension_semantics = [#tpu.dimension_semantics<parallel>], iteration_bounds = array<i64: 2>, scalar_prefetch = 0 : i64, scratch_operands = 0 : i64, tpu.core_type = #tpu.core_type<tc>, window_params = [{transform_indices = @transform_0, window_bounds = array<i64: 1, 6, 64>}, {transform_indices = @transform_1, window_bounds = array<i64: 1, 6, 64>}, {pipeline_mode = #tpu.pipeline_mode<synchronous>, transform_indices = @transform_2, window_bounds = array<i64: 24, 6>}, {pipeline_mode = #tpu.pipeline_mode<synchronous>, transform_indices = @transform_3, window_bounds = array<i64: 24, 1>}, {transform_indices = @transform_4, window_bounds = array<i64: 1, 30, 64>}]} {
    %c0 = arith.constant 0 : index
    %c0_0 = arith.constant 0 : index
    %0 = vector.load %arg3[%c0, %c0_0] : memref<24x6xf32, #tpu.memory_space<vmem>>, vector<24x6xf32>
    %c0_1 = arith.constant 0 : index
    %c0_2 = arith.constant 0 : index
    %1 = vector.load %arg4[%c0_1, %c0_2] : memref<24x1xf32, #tpu.memory_space<vmem>>, vector<24x1xf32>
    %c0_3 = arith.constant 0 : index
    %c0_4 = arith.constant 0 : index
    %c0_5 = arith.constant 0 : index
    %2 = vector.load %arg1[%c0_3, %c0_4, %c0_5] : memref<1x6x64xf32, #tpu.memory_space<vmem>>, vector<1x6x64xf32>
    %3 = vector.shape_cast %2 : vector<1x6x64xf32> to vector<6x64xf32>
    %cst = arith.constant dense<0.000000e+00> : vector<24x64xf32>
    %4 = tpu.matmul %0, %3, %cst {dimension_numbers = #tpu.dot_dimension_numbers<[1], [0], [0], [1], [0, 0, 1, 1], [], []>, precision = #tpu.contract_precision<fp32>} : vector<24x6xf32>, vector<6x64xf32>, vector<24x64xf32> -> vector<24x64xf32>
    %5 = vector.broadcast %1 : vector<24x1xf32> to vector<24x64xf32>
    %6 = arith.addf %4, %5 : vector<24x64xf32>
    %c0_6 = arith.constant 0 : index
    %c0_7 = arith.constant 0 : index
    %c0_8 = arith.constant 0 : index
    %7 = vector.load %arg2[%c0_6, %c0_7, %c0_8] : memref<1x6x64xf32, #tpu.memory_space<vmem>>, vector<1x6x64xf32>
    %8 = vector.shape_cast %7 : vector<1x6x64xf32> to vector<6x64xf32>
    %cst_9 = arith.constant 0.000000e+00 : f32
    %9 = vector.broadcast %cst_9 : f32 to vector<24x64xf32>
    %10 = arith.maximumf %6, %9 : vector<24x64xf32>
    %11 = tpu.concatenate %8, %10 in 0 : vector<6x64xf32>, vector<24x64xf32> -> vector<30x64xf32>
    %c0_10 = arith.constant 0 : index
    %c0_11 = arith.constant 0 : index
    %c0_12 = arith.constant 0 : index
    %12 = vector.load %arg5[%c0_10, %c0_11, %c0_12] : memref<1x30x64xf32, #tpu.memory_space<vmem>>, vector<1x30x64xf32>
    %13 = vector.shape_cast %12 : vector<1x30x64xf32> to vector<30x64xf32>
    %14 = vector.shape_cast %11 : vector<30x64xf32> to vector<1x30x64xf32>
    tpu.vector_store %arg5[%c0_10, %c0_11, %c0_12], %14 {strides = array<i32>} : memref<1x30x64xf32, #tpu.memory_space<vmem>>, vector<1x30x64xf32>,
    return
  }
  func.func @transform_0(%arg0: i32) -> (i32, i32, i32) {
    %c0_i32 = arith.constant 0 : i32
    %c0_i32_0 = arith.constant 0 : i32
    %c0_i32_1 = arith.constant 0 : i32
    return %arg0, %c0_i32, %c0_i32_0 : i32, i32, i32
  }
  func.func @transform_1(%arg0: i32) -> (i32, i32, i32) {
    %c0_i32 = arith.constant 0 : i32
    %c0_i32_0 = arith.constant 0 : i32
    %c0_i32_1 = arith.constant 0 : i32
    return %arg0, %c0_i32, %c0_i32_0 : i32, i32, i32
  }
  func.func @transform_2(%arg0: i32) -> (i32, i32) {
    %c0_i32 = arith.constant 0 : i32
    %c0_i32_0 = arith.constant 0 : i32
    %c0_i32_1 = arith.constant 0 : i32
    return %c0_i32, %c0_i32_0 : i32, i32
  }
  func.func @transform_3(%arg0: i32) -> (i32, i32) {
    %c0_i32 = arith.constant 0 : i32
    %c0_i32_0 = arith.constant 0 : i32
    %c0_i32_1 = arith.constant 0 : i32
    return %c0_i32, %c0_i32_0 : i32, i32
  }
  func.func @transform_4(%arg0: i32) -> (i32, i32, i32) {
    %c0_i32 = arith.constant 0 : i32
    %c0_i32_0 = arith.constant 0 : i32
    %c0_i32_1 = arith.constant 0 : i32
    return %arg0, %c0_i32, %c0_i32_0 : i32, i32, i32
  }
}

</mosaic_0001>

<bundles_post_ra>
// kernel: shufflenet_unit_b_pallas.3
= control target key start
LH: loop header
LB: loop body
LE: loop exit
PB: predicated region body
PF: predicated region fallthrough
CT: control target
= control target key end

     0   :  { %s863_s15 = smov 0   ;;  %s899_s0 = inlined_call_operand.vmem [shape: f32[2,6,256], index: 0, kind: input, shape index: {}]   ;;  %s900_s1 = inlined_call_operand.vmem [shape: f32[6,6], index: 1, kind: input, shape index: {}]   ;;  %s901_s2 = inlined_call_operand.vmem [shape: f32[6,1], index: 2, kind: input, shape index: {}]   ;;  %s902_s3 = inlined_call_operand.vmem [shape: f32[2,6,1], index: 3, kind: output, shape index: {0}]   ;;  %s903_s4 = inlined_call_operand.vmem [shape: f32[2,6,1], index: 4, kind: output, shape index: {1}]  }
   0x1 LB: > { %s793_s16 = sadd.s32 4294967295, %s834_s15   ;;  %p797_p0 = scmp.ge.s32.totalorder %s834_s15, 1  ;;  %s834_s15 = sphi %s863_s15, %s15_s15  }
   0x2   : > { %p165_p1 = scmp.lt.s32.totalorder %s834_s15, 3 }
   0x4   : > { %p166_p2 = pnand %p797_p0, %p165_p1 }
   0x5   : > { %p194_p3 = scmp.lt.s32.totalorder (!%p166_p2), %s793_s16, 1  ;;  %v207_v0 = vld [vmem:[%s900_s1] sm:$0x3f] (!%p166_p2)  ;;  %vm216_vm0 = vcmask (!%p166_p2), 48128   ;;  %v836_v1 = vmov (!%p166_p2), 0.0   ;;  %v837_v5 = vmov (!%p166_p2), 0  }
   0x6   : > { %169 = sbr.rel (%p166_p2) target bundleno = 403 (0x193), region = 32  ;;  %293 = vmatprep.mubr.f32.mxu1 (!%p166_p2), %v836_v1  ;;  %530 = vmatprep.mubr.f32.mxu0 (!%p166_p2), %v836_v1  ;;  %v218_v2 = vsel (!%p166_p2), %vm216_vm0, %v207_v0, 0  ;;  %v208_v3 = vld [vmem:[%s901_s2] sm:$0x3f] (!%p166_p2)  ;;  %vm220_vm1 = vcmask (!%p166_p2), 1045504   ;;  %vm706_vm2 = vcmask (!%p166_p2), 5120  }
   0x7   : > { %v294_v4 = vand.u32 (!%p166_p2), 4294901760, %v218_v2  ;;  %827 = vset.pattern.permute.xlu0 (!%p166_p2), %v837_v5 }
   0x8   : > { %213 = vperm.xlu0 (!%p166_p2), %827, %v208_v3  }
   0x9   : > { %v295_v6 = vsub.f32 (!%p166_p2), %v218_v2, %v294_v4 }
   0xb   : > { %v296_v9 = vand.u32 (!%p166_p2), 4294901760, %v295_v6 }
   0xd   : > { %s905_s16 = smov (!%p194_p3, %s793_s16), 1  ;;  %v297_v14 = vsub.f32 %v295_v6, %v296_v9 }
   0xe   : > { %s804_s21 = sshll.u32 %s905_s16, 4  ;;  %s800_s25 = sshll.u32 %s905_s16, 3 }
   0xf   : > { %s198_s24 = scalar_lea.vmem %s899_s0, %s804_s21  ;;  %v298_v16 = vand.u32 4294901760, %v297_v14  ;;  %s202_s28 = scalar_lea.vmem %s902_s3, %s800_s25 }
  0x10   : > { %v210_v7 = vld [vmem:[%s198_s24 + $0x8] sm:$0x3f]  ;;  %v209_v8 = vld [vmem:[%s198_s24] sm:$0x3f]  ;;  %s206_s5 = scalar_lea.vmem %s903_s4, %s800_s25 }
  0x11   : > { %v225_v10 = vsel %vm220_vm1, %v210_v7, 0  ;;  %v222_v11 = vsel %vm220_vm1, %v209_v8, 0 }
  0x12   : > { %v227_v12 = vand.u32 4294901760, %v225_v10  ;;  %v229_v13 = vand.u32 4294901760, %v222_v11 }
  0x14   : > { %228 = vmatprep.subr.mxu1 %v227_v12  ;;  %465 = vmatprep.subr.mxu0 %v227_v12  ;;  %v312_v15 = vsub.f32 %v222_v11, %v229_v13  ;;  %v306_v17 = vsub.f32 %v225_v10, %v227_v12 }
  0x15   : > { %230 = vmatpush1.msra.mxu1 %v229_v13  ;;  %467 = vmatpush1.msra.mxu0 %v229_v13 }
  0x16   : > { %299 = vmatmul.mubr.f32.vlgmr.msra.gmra.mrb[0].mxu1 %v298_v16  ;;  %534 = vmatmul.mubr.f32.vlgmr.msra.gmra.mrb[0].mxu0 %v296_v9  ;;  %v307_v18 = vand.u32 4294901760, %v306_v17  ;;  %v313_v19 = vand.u32 4294901760, %v312_v15 }
  0x17   : > { %379 = vmatprep.mubr.f32.mxu1 %v836_v1  ;;  %610 = vmatprep.mubr.f32.mxu0 %v836_v1 }
  0x18   : > { %v308_v20 = vsub.f32 %v306_v17, %v307_v18  ;;  %543 = vmatprep.subr.mxu0 %v307_v18  ;;  %v314_v21 = vsub.f32 %v312_v15, %v313_v19 }
  0x19   : > { %547 = vmatpush1.msra.mxu0 %v313_v19 }
  0x1a   : > { %v309_v22 = vand.u32 4294901760, %v308_v20  ;;  %v315_v23 = vand.u32 4294901760, %v314_v21  ;;  %619 = vmatprep.subr.mxu0 %v227_v12 }
  0x1c   : > { %310 = vmatprep.subr.mxu1 %v309_v22 }
  0x1d   : > { %316 = vmatpush1.msra.mxu1 %v315_v23 }
  0x1e   : > { %381 = vmatmul.mubr.f32.vlgmr.msra.gmra.mrb[0].mxu1 %v294_v4  ;;  %612 = vmatmul.mubr.f32.vlgmr.msra.gmra.mrb[0].mxu0 %v294_v4 }
  0x1f   : > { %389 = vmatprep.subr.mxu1 %v306_v17  ;;  %455 = vmatprep.mubr.f32.mxu1 %v836_v1 }
  0x20   : > { %392 = vmatpush1.msra.mxu1 %v312_v15  ;;  %621 = vmatpush1.msra.mxu0 %v229_v13 }
  0x21   : > { %684 = vmatprep.mubr.f32.mxu0 %v836_v1 }
  0x26   : > { %458 = vmatmul.mubr.f32.vlgmr.msra.gmra.mrb[0].mxu1 %v295_v6  ;;  %686 = vmatmul.mubr.f32.vlgmr.msra.gmra.mrb[0].mxu0 %v294_v4 }
  0x87   : > { %v214_v24 = vpop.permute.xlu0 %213 }
  0xf9   : > { %v459_v25 = vpop.f32.mrb[0].mxu1  ;;  %v687_v26 = vpop.f32.mrb[0].mxu0 }
  0xfa   : > { %v805_v27 = vadd.f32 %v459_v25, %v214_v24  ;;  %v461_v28 = vpop.f32.mrb[1].mxu1  ;;  %v689_v29 = vpop.f32.mrb[1].mxu0 }
  0xfb   : > { %v807_v30 = vadd.f32 %v461_v28, %v214_v24 }
  0xfc   : > { %v806_v31 = vadd.f32 %v805_v27, %v687_v26 }
  0xfd   : > { %v808_v32 = vadd.f32 %v807_v30, %v689_v29 }
  0xfe   : > { %v698_v33 = vmul.f32 %v806_v31, %v806_v31  ;;  %v692_v34 = vsel %vm220_vm1, %v806_v31, 0.0 }
  0xff   : > { %v699_v35 = vmul.f32 %v808_v32, %v808_v32  ;;  %v693_v36 = vsel %vm220_vm1, %v808_v32, 0.0 }
 0x100   : > { %v694_v37 = vadd.f32 %v693_v36, %v692_v34  ;;  %v700_v38 = vsel %vm220_vm1, %v698_v33, 0.0 }
 0x101   : > { %v701_v39 = vsel %vm220_vm1, %v699_v35, 0.0 }
 0x102   : > { %695 = vadd.xlane.f32.xlu0 %v694_v37  ;;  %v702_v40 = vadd.f32 %v701_v39, %v700_v38 }
 0x104   : > { %703 = vadd.xlane.f32.xlu1 %v702_v40 }
 0x18f   : > { %v696_v41 = vpop.xlane.xlu0 %695 }
 0x190   : > { %707 = vst.msk [vmem:[%s202_s28] sm:$0x3f] %vm706_vm2, %v696_v41 }
 0x191   : > { %v704_v42 = vpop.xlane.xlu1 %703 }
 0x192   : > { %708 = vst.msk [vmem:[%s206_s5] sm:$0x3f] %vm706_vm2, %v704_v42 }
 0x193 PF: > { %s15_s15 = sadd.s32 1, %s834_s15  }
 0x194   : > { %p12_p4 = scmp.ge.s32.totalorder %s15_s15, 4  }
 0x196   :  { %14 = sbr.rel (!%p12_p4) target bundleno = 1 (0x1), region = 74 }

// kernel: shufflenet_unit_b_pallas.5
= control target key start
LH: loop header
LB: loop body
LE: loop exit
PB: predicated region body
PF: predicated region fallthrough
CT: control target
= control target key end

     0   :  { %s1051_s15 = smov 0   ;;  %s1164_s0 = inlined_call_operand.vmem [shape: f32[2,6,64], index: 0, kind: input, shape index: {}]   ;;  %s1165_s1 = inlined_call_operand.vmem [shape: f32[2,6,64], index: 1, kind: input, shape index: {}]   ;;  %s1166_s2 = inlined_call_operand.vmem [shape: f32[24,6], index: 2, kind: input, shape index: {}]   ;;  %s1167_s3 = inlined_call_operand.vmem [shape: f32[24,1], index: 3, kind: input, shape index: {}]   ;;  %s1168_s4 = inlined_call_operand.vmem [shape: f32[2,30,64], index: 4, kind: output, shape index: {}]  }
   0x1 LB: > { %s870_s16 = sadd.s32 4294967295, %s1021_s15   ;;  %p874_p0 = scmp.ge.s32.totalorder %s1021_s15, 1  ;;  %s1021_s15 = sphi %s1051_s15, %s14_s15  }
   0x2   : > { %p170_p1 = scmp.lt.s32.totalorder %s1021_s15, 3 }
   0x4   : > { %p171_p2 = pnand %p874_p0, %p170_p1 }
   0x5   : > { %p199_p3 = scmp.lt.s32.totalorder (!%p171_p2), %s870_s16, 1  ;;  %v212_v0 = vld [vmem:[%s1166_s2] sm:$0xff] (!%p171_p2)  ;;  %vm234_vm0 = vcmask (!%p171_p2), 48128   ;;  %v1023_v1 = vmov (!%p171_p2), 0.0   ;;  %v213_v3 = vld [vmem:[%s1166_s2 + $0x8] sm:$0xff] (!%p171_p2)  ;;  %v214_v4 = vld [vmem:[%s1166_s2 + $0x10] sm:$0xff] (!%p171_p2) }
   0x6   : > { %174 = sbr.rel (%p171_p2) target bundleno = 276 (0x114), region = 36  ;;  %939 = vmatprep.subr.mxu0 (!%p171_p2), %v1023_v1  ;;  %906 = vmatprep.subr.mxu1 (!%p171_p2), %v1023_v1  ;;  %v236_v2 = vsel (!%p171_p2), %vm234_vm0, %v212_v0, 0  ;;  %v215_v5 = vld [vmem:[%s1167_s3] sm:$0xff] (!%p171_p2)  ;;  %vm1024_vm1 = vmmov (!%p171_p2), 0   ;;  %v239_v7 = vsel (!%p171_p2), %vm234_vm0, %v213_v3, 0  ;;  %v242_v8 = vsel (!%p171_p2), %vm234_vm0, %v214_v4, 0 }
   0x7   : > { %941 = vmatprep.mubr.msk.f32.mxu0 (!%p171_p2), %vm1024_vm1, %v1023_v1  ;;  %908 = vmatprep.mubr.msk.f32.mxu1 (!%p171_p2), %vm1024_vm1, %v1023_v1  ;;  %v1079_v6 = vand.u32 (!%p171_p2), 4294901760, %v236_v2  ;;  %v217_v9 = vld [vmem:[%s1167_s3 + $0x10] sm:$0xff] (!%p171_p2)  ;;  %v1084_v10 = vand.u32 (!%p171_p2), 4294901760, %v239_v7  ;;  %v1086_v11 = vand.u32 (!%p171_p2), 4294901760, %v242_v8  ;;  %v1025_v12 = vmov (!%p171_p2), 0   ;;  %v216_v16 = vld [vmem:[%s1167_s3 + $0x8] sm:$0xff] (!%p171_p2) }
   0x8   : > { %1013 = vset.pattern.permute.xlu0 (!%p171_p2), %v1025_v12  ;;  %1014 = vset.pattern.permute.xlu1 (!%p171_p2), %v1025_v12  ;;  %vm244_vm2 = vcmask (!%p171_p2), 1045504   ;;  %vm797_vm3 = vcmask (!%p171_p2), 523264   ;;  %vm801_vm4 = vcmask (!%p171_p2), 521216  }
   0x9   : > { %v315_v13 = vsub.f32 (!%p171_p2), %v236_v2, %v1079_v6  ;;  %221 = vperm.xlu0 (!%p171_p2), %1013, %v215_v5   ;;  %231 = vperm.xlu1 (!%p171_p2), %1014, %v217_v9   ;;  %v325_v14 = vsub.f32 (!%p171_p2), %v239_v7, %v1084_v10  ;;  %v335_v15 = vsub.f32 (!%p171_p2), %v242_v8, %v1086_v11 }
   0xb   : > { %v316_v18 = vand.u32 (!%p171_p2), 4294901760, %v315_v13  ;;  %v326_v20 = vand.u32 (!%p171_p2), 4294901760, %v325_v14  ;;  %v336_v23 = vand.u32 (!%p171_p2), 4294901760, %v335_v15 }
   0xd   : > { %s1170_s16 = smov (!%p199_p3, %s870_s16), 1  ;;  %v317_v22 = vsub.f32 %v315_v13, %v316_v18  ;;  %226 = vperm.xlu0 %1013, %v216_v16   ;;  %v327_v24 = vsub.f32 %v325_v14, %v326_v20  ;;  %v337_v29 = vsub.f32 %v335_v15, %v336_v23 }
   0xe   : > { %s875_s27 = sshll.u32 %s1170_s16, 3  ;;  %s881_s10 = sshll.u32 %s1170_s16, 5 }
   0xf   : > { %s202_s30 = scalar_lea.vmem %s1164_s0, %s875_s27  ;;  %v318_v26 = vand.u32 4294901760, %v317_v22  ;;  %v328_v27 = vand.u32 4294901760, %v327_v24  ;;  %v338_v32 = vand.u32 4294901760, %v337_v29  ;;  %s206_s9 = scalar_lea.vmem %s1165_s1, %s875_s27 }
  0x10   : > { %v218_v17 = vld [vmem:[%s202_s30] sm:$0x3f]  ;;  %s211_s13 = scalar_lea.vmem %s1168_s4, %s881_s10 }
  0x11   : > { %v246_v19 = vsel %vm244_vm2, %v218_v17, 0  ;;  %v780_v47 = vld [vmem:[%s206_s9] sm:$0x3f] }
  0x12   : > { %v249_v21 = vand.u32 4294901760, %v246_v19 }
  0x14   : > { %v346_v25 = vsub.f32 %v246_v19, %v249_v21  ;;  %940 = vmatpush3.msra.mxu0 %v249_v21  ;;  %907 = vmatpush3.msra.mxu1 %v249_v21 }
  0x15   : > { %942 = vmatmul.mubr.f32.vlgmr.msra.gmra.mrb[0].mxu0 %v316_v18  ;;  %917 = vmatprep.subr.mxu1 %v1023_v1 }
  0x16   : > { %909 = vmatmul.mubr.f32.vlgmr.msra.gmra.mrb[0].mxu1 %v318_v26  ;;  %944 = vmatprep.mubr.msk.f32.mxu0 %vm1024_vm1, %v1023_v1  ;;  %v347_v28 = vand.u32 4294901760, %v346_v25 }
  0x17   : > { %911 = vmatprep.mubr.msk.f32.mxu1 %vm1024_vm1, %v1023_v1  ;;  %950 = vmatprep.subr.mxu0 %v1023_v1 }
  0x18   : > { %v348_v30 = vsub.f32 %v346_v25, %v347_v28  ;;  %951 = vmatpush3.msra.mxu0 %v347_v28 }
  0x19   : > { %945 = vmatmul.mubr.f32.gmra.mrb[2].mxu0 %v326_v20  ;;  %961 = vmatprep.subr.mxu0 %v1023_v1 }
  0x1a   : > { %912 = vmatmul.mubr.f32.gmra.mrb[2].mxu1 %v328_v27  ;;  %v349_v31 = vand.u32 4294901760, %v348_v30  ;;  %947 = vmatprep.mubr.msk.f32.mxu0 %vm1024_vm1, %v1023_v1 }
  0x1b   : > { %914 = vmatprep.mubr.msk.f32.mxu1 %vm1024_vm1, %v1023_v1 }
  0x1c   : > { %918 = vmatpush3.msra.mxu1 %v349_v31 }
  0x1d   : > { %948 = vmatmul.mubr.f32.gmra.mrb[4].mxu0 %v336_v23  ;;  %928 = vmatprep.subr.mxu1 %v1023_v1 }
  0x1e   : > { %915 = vmatmul.mubr.f32.gmra.mrb[4].mxu1 %v338_v32  ;;  %952 = vmatprep.mubr.msk.f32.mxu0 %vm1024_vm1, %v1023_v1 }
  0x1f   : > { %919 = vmatprep.mubr.msk.f32.mxu1 %vm1024_vm1, %v1023_v1 }
  0x21   : > { %953 = vmatmul.mubr.f32.vlgmr.msra.gmra.mrb[0].mxu0 %v1079_v6 }
  0x22   : > { %920 = vmatmul.mubr.f32.vlgmr.msra.gmra.mrb[0].mxu1 %v1079_v6  ;;  %955 = vmatprep.mubr.msk.f32.mxu0 %vm1024_vm1, %v1023_v1 }
  0x23   : > { %922 = vmatprep.mubr.msk.f32.mxu1 %vm1024_vm1, %v1023_v1  ;;  %929 = vmatpush3.msra.mxu1 %v346_v25 }
  0x24   : > { %962 = vmatpush3.msra.mxu0 %v249_v21 }
  0x25   : > { %956 = vmatmul.mubr.f32.gmra.mrb[2].mxu0 %v1084_v10 }
  0x26   : > { %923 = vmatmul.mubr.f32.gmra.mrb[2].mxu1 %v1084_v10  ;;  %958 = vmatprep.mubr.msk.f32.mxu0 %vm1024_vm1, %v1023_v1 }
  0x27   : > { %925 = vmatprep.mubr.msk.f32.mxu1 %vm1024_vm1, %v1023_v1 }
  0x29   : > { %959 = vmatmul.mubr.f32.gmra.mrb[4].mxu0 %v1086_v11 }
  0x2a   : > { %926 = vmatmul.mubr.f32.gmra.mrb[4].mxu1 %v1086_v11  ;;  %963 = vmatprep.mubr.msk.f32.mxu0 %vm1024_vm1, %v1023_v1 }
  0x2b   : > { %930 = vmatprep.mubr.msk.f32.mxu1 %vm1024_vm1, %v1023_v1 }
  0x2d   : > { %964 = vmatmul.mubr.f32.vlgmr.msra.gmra.mrb[0].mxu0 %v1079_v6 }
  0x2e   : > { %931 = vmatmul.mubr.f32.vlgmr.msra.gmra.mrb[0].mxu1 %v315_v13  ;;  %966 = vmatprep.mubr.msk.f32.mxu0 %vm1024_vm1, %v1023_v1 }
  0x2f   : > { %933 = vmatprep.mubr.msk.f32.mxu1 %vm1024_vm1, %v1023_v1 }
  0x31   : > { %967 = vmatmul.mubr.f32.gmra.mrb[2].mxu0 %v1084_v10 }
  0x32   : > { %934 = vmatmul.mubr.f32.gmra.mrb[2].mxu1 %v325_v14  ;;  %969 = vmatprep.mubr.msk.f32.mxu0 %vm1024_vm1, %v1023_v1 }
  0x33   : > { %936 = vmatprep.mubr.msk.f32.mxu1 %vm1024_vm1, %v1023_v1 }
  0x35   : > { %970 = vmatmul.mubr.f32.gmra.mrb[4].mxu0 %v1086_v11 }
  0x36   : > { %937 = vmatmul.mubr.f32.gmra.mrb[4].mxu1 %v335_v15 }
  0x88   : > { %v222_v33 = vpop.permute.xlu0 %221  ;;  %v232_v48 = vpop.permute.xlu1 %231 }
  0x8c   : > { %v227_v39 = vpop.permute.xlu0 %226 }
 0x100   : > { %v764_v34 = vpop.f32.mrb[0].mxu0 }
 0x101   : > { %v502_v35 = vpop.f32.mrb[0].mxu1  ;;  %v965_v36 = vpop.f32.mrb[1].mxu0 }
 0x102   : > { %v972_v37 = vadd.f32 %v502_v35, %v222_v33  ;;  %v932_v38 = vpop.f32.mrb[1].mxu1 }
 0x104   : > { %v973_v40 = vadd.f32 %v972_v37, %v764_v34  ;;  %v770_v41 = vpop.f32.mrb[2].mxu0 }
 0x105   : > { %v509_v42 = vpop.f32.mrb[2].mxu1  ;;  %v968_v43 = vpop.f32.mrb[3].mxu0 }
 0x106   : > { %v781_v44 = vmax.f32 %v973_v40, 0.0  ;;  %v974_v45 = vadd.f32 %v509_v42, %v227_v39  ;;  %v935_v46 = vpop.f32.mrb[3].mxu1 }
 0x108   : > { %v787_v49 = vrot.slane %v781_v44, 2  ;;  %v975_v50 = vadd.f32 %v974_v45, %v770_v41  ;;  %v776_v51 = vpop.f32.mrb[4].mxu0 }
 0x109   : > { %v516_v52 = vpop.f32.mrb[4].mxu1  ;;  %v971_v53 = vpop.f32.mrb[5].mxu0 }
 0x10a   : > { %v796_v54 = vsel %vm244_vm2, %v780_v47, %v787_v49  ;;  %v782_v55 = vmax.f32 %v975_v50, 0.0  ;;  %v976_v56 = vadd.f32 %v516_v52, %v232_v48  ;;  %v938_v57 = vpop.f32.mrb[5].mxu1 }
 0x10b   : > { %798 = vst.msk [vmem:[%s211_s13] sm:$0xff] %vm797_vm3, %v796_v54 }
 0x10c   : > { %v788_v58 = vrot.slane %v782_v55, 2  ;;  %v977_v59 = vadd.f32 %v976_v56, %v776_v51 }
 0x10e   : > { %v789_v60 = vsel %vm244_vm2, %v787_v49, %v788_v58  ;;  %v783_v61 = vmax.f32 %v977_v59, 0.0 }
 0x10f   : > { %799 = vst.msk [vmem:[%s211_s13 + $0x8] sm:$0xff] %vm797_vm3, %v789_v60 }
 0x110   : > { %v790_v62 = vrot.slane %v783_v61, 2 }
 0x112   : > { %v791_v63 = vsel %vm244_vm2, %v788_v58, %v790_v62  ;;  %802 = vst.msk [vmem:[%s211_s13 + $0x18] sm:$0x3f] %vm801_vm4, %v790_v62 }
 0x113   : > { %800 = vst.msk [vmem:[%s211_s13 + $0x10] sm:$0xff] %vm797_vm3, %v791_v63 }
 0x114 PF: > { %s14_s15 = sadd.s32 1, %s1021_s15  }
 0x115   : > { %p11_p4 = scmp.ge.s32.totalorder %s14_s15, 4  }
 0x117   :  { %13 = sbr.rel (!%p11_p4) target bundleno = 1 (0x1), region = 69 }

// kernel: shufflenet_unit_b_pallas.4
= control target key start
LH: loop header
LB: loop body
LE: loop exit
PB: predicated region body
PF: predicated region fallthrough
CT: control target
= control target key end

     0   :  { %s1840_s13 = smov 0   ;;  %s1985_s0 = inlined_call_operand.vmem [shape: f32[2,6,256], index: 0, kind: input, shape index: {}]   ;;  %s1986_s1 = inlined_call_operand.vmem [shape: f32[6,6], index: 1, kind: input, shape index: {}]   ;;  %s1987_s2 = inlined_call_operand.vmem [shape: f32[6,1], index: 2, kind: input, shape index: {}]   ;;  %s1988_s3 = inlined_call_operand.vmem [shape: f32[6,1], index: 3, kind: input, shape index: {}]   ;;  %s1989_s4 = inlined_call_operand.vmem [shape: f32[6,1], index: 4, kind: input, shape index: {}]   ;;  %s1990_s5 = inlined_call_operand.vmem [shape: f32[9,6,1], index: 5, kind: input, shape index: {}]   ;;  %s1991_s6 = inlined_call_operand.vmem [shape: f32[6,1], index: 6, kind: input, shape index: {}]   ;;  %s1992_s7 = inlined_call_operand.vmem [shape: f32[2,6,64], index: 7, kind: output, shape index: {0}]   ;;  %s1993_s8 = inlined_call_operand.vmem [shape: f32[2,6,64], index: 8, kind: output, shape index: {1}]   ;;  %s1994_s9 = inlined_call_operand.vmem [shape: f32[2,6,1], index: 9, kind: output, shape index: {2}]   ;;  %s1995_s10 = inlined_call_operand.vmem [shape: f32[2,6,6], index: 10, kind: output, shape index: {3}]  }
   0x1 LB: > { %s1671_s14 = sadd.s32 4294967295, %s1775_s13   ;;  %p1675_p0 = scmp.ge.s32.totalorder %s1775_s13, 1  ;;  %s1775_s13 = sphi %s1840_s13, %s21_s13  }
   0x2   : > { %p319_p1 = scmp.lt.s32.totalorder %s1775_s13, 3 }
   0x4   : > { %p320_p2 = pnand %p1675_p0, %p319_p1 }
   0x5   : > { %p368_p3 = scmp.lt.s32.totalorder (!%p320_p2), %s1671_s14, 1  ;;  %v389_v0 = vld [vmem:[%s1986_s1] sm:$0x3f] (!%p320_p2)  ;;  %vm431_vm0 = vcmask (!%p320_p2), 48128   ;;  %v1777_v1 = vmov (!%p320_p2), 0.0   ;;  %v1778_v5 = vmov (!%p320_p2), 0   ;;  %v403_v55 = vlaneseq (!%p320_p2) }
   0x6   : > { %323 = sbr.rel (%p320_p2) target bundleno = 688 (0x2b0), region = 48  ;;  %508 = vmatprep.mubr.f32.mxu0 (!%p320_p2), %v1777_v1  ;;  %v433_v2 = vsel (!%p320_p2), %vm431_vm0, %v389_v0, 0  ;;  %v390_v3 = vld [vmem:[%s1987_s2] sm:$0x3f] (!%p320_p2)  ;;  %1699 = vmatprep.subr.mxu1 (!%p320_p2), %v1777_v1  ;;  %vm435_vm1 = vcmask (!%p320_p2), 1045504   ;;  %s1779_s27 = smov (!%p320_p2), 65  }
   0x7   : > { %v1858_v4 = vand.u32 (!%p320_p2), 4294901760, %v433_v2  ;;  %1767 = vset.pattern.permute.xlu0 (!%p320_p2), %v1778_v5  ;;  %1768 = vset.pattern.permute.xlu1 (!%p320_p2), %v1778_v5  ;;  %v392_v6 = vld [vmem:[%s1989_s4] sm:$0x3f] (!%p320_p2)  ;;  %v398_v9 = vld [vmem:[%s1990_s5 + $0x28] sm:$0x3f] (!%p320_p2)  ;;  %s1781_s29 = smov (!%p320_p2), 64  }
   0x8   : > { %428 = vperm.xlu0 (!%p320_p2), %1767, %v390_v3   ;;  %916 = vperm.xlu1 (!%p320_p2), %1768, %v392_v6   ;;  %v391_v8 = vld [vmem:[%s1988_s3] sm:$0x3f] (!%p320_p2)  ;;  %v396_v25 = vld [vmem:[%s1990_s5 + $0x18] sm:$0x3f] (!%p320_p2)  ;;  %v394_v31 = vld [vmem:[%s1990_s5 + $0x8] sm:$0x3f] (!%p320_p2) }
   0x9   : > { %v510_v7 = vsub.f32 (!%p320_p2), %v433_v2, %v1858_v4  ;;  %v401_v18 = vld [vmem:[%s1990_s5 + $0x40] sm:$0x3f] (!%p320_p2)  ;;  %v400_v26 = vld [vmem:[%s1990_s5 + $0x38] sm:$0x3f] (!%p320_p2)  ;;  %v399_v32 = vld [vmem:[%s1990_s5 + $0x30] sm:$0x3f] (!%p320_p2) }
   0xa   : > { %v397_v19 = vld [vmem:[%s1990_s5 + $0x20] sm:$0x3f] (!%p320_p2)  ;;  %v395_v33 = vld [vmem:[%s1990_s5 + $0x10] sm:$0x3f] (!%p320_p2)  ;;  %s1782_s12 = smov (!%p320_p2), 72   ;;  %s1783_s15 = smov (!%p320_p2), 73  }
   0xb   : > { %v511_v12 = vand.u32 (!%p320_p2), 4294901760, %v510_v7  ;;  %v393_v34 = vld [vmem:[%s1990_s5] sm:$0x3f] (!%p320_p2)  ;;  %vm1784_vm2 = vmmov (!%p320_p2), 0   ;;  %v404_v57 = vand.u32 (!%p320_p2), 127, %v403_v55  ;;  %vm964_vm5 = vcmask (!%p320_p2), 64512  }
   0xc   : > { %909 = vperm.xlu0 (!%p320_p2), %1767, %v391_v8   ;;  %931 = vperm.xlu1 (!%p320_p2), %1768, %v398_v9   ;;  %v402_v52 = vld [vmem:[%s1991_s6] sm:$0x3f] (!%p320_p2)  ;;  %vm1071_vm6 = vcmask (!%p320_p2), 523264   ;;  %vm1063_vm7 = vcmask (!%p320_p2), 521216   ;;  %vm1521_vm8 = vcmask (!%p320_p2), 5120   ;;  %vm1523_vm9 = vcmask (!%p320_p2), 46080  }
   0xd   : > { %s1997_s14 = smov (!%p368_p3, %s1671_s14), 1  ;;  %v512_v17 = vsub.f32 %v510_v7, %v511_v12  ;;  %1701 = vmatprep.mubr.msk.f32.mxu1 %vm1784_vm2, %v1777_v1  ;;  %v409_v60 = vand.u32 7, %v404_v57  ;;  %vm420_vm4 = vcmp.ge.s32.totalorder %v404_v57, 8 }
   0xe   : > { %s1686_s21 = sshll.u32 %s1997_s14, 4  ;;  %s1939_s16 = sshll.u32 %s1997_s14, 3 }
   0xf   : > { %s372_s28 = scalar_lea.vmem %s1985_s0, %s1686_s21  ;;  %v513_v21 = vand.u32 4294901760, %v512_v17  ;;  %vm417_vm3 = vcmp.ne.s32.totalorder %v409_v60, 0  ;;  %s376_s19 = scalar_lea.vmem %s1992_s7, %s1939_s16 }
  0x10   : > { %v1874_v10 = vld [vmem:[%s372_s28 + $0x8] sm:$0x3f]  ;;  %v1876_v11 = vld [vmem:[%s372_s28] sm:$0x3f]  ;;  %977 = vperm.xlu0 %1767, %v401_v18   ;;  %925 = vperm.xlu1 %1768, %v397_v19   ;;  %s1780_s28 = smov 8   ;;  %v1926_v63 = vsel %vm417_vm3, 1.0, %v1777_v1  ;;  %s380_s21 = scalar_lea.vmem %s1993_s8, %s1939_s16 }
  0x11   : > { %v440_v13 = vsel %vm435_vm1, %v1874_v10, 0  ;;  %v437_v14 = vsel %vm435_vm1, %v1876_v11, 0  ;;  %s384_s24 = scalar_lea.vmem %s1994_s9, %s1939_s16 }
  0x12   : > { %v442_v15 = vand.u32 4294901760, %v440_v13  ;;  %v444_v16 = vand.u32 4294901760, %v437_v14 }
  0x14   : > { %443 = vmatprep.subr.mxu0 %v442_v15  ;;  %v527_v20 = vsub.f32 %v437_v14, %v444_v16  ;;  %v521_v22 = vsub.f32 %v440_v13, %v442_v15  ;;  %947 = vperm.xlu0 %1767, %v396_v25  }
  0x15   : > { %445 = vmatpush1.msra.mxu0 %v444_v16  ;;  %954 = vperm.xlu1 %1768, %v400_v26  }
  0x16   : > { %514 = vmatmul.mubr.f32.vlgmr.msra.gmra.mrb[0].mxu0 %v513_v21  ;;  %v522_v23 = vand.u32 4294901760, %v521_v22  ;;  %v528_v24 = vand.u32 4294901760, %v527_v20 }
  0x17   : > { %594 = vmatprep.mubr.f32.mxu0 %v1777_v1 }
  0x18   : > { %v523_v27 = vsub.f32 %v521_v22, %v522_v23  ;;  %v529_v28 = vsub.f32 %v527_v20, %v528_v24  ;;  %970 = vperm.xlu0 %1767, %v394_v31  }
  0x19   : > { %992 = vperm.xlu1 %1768, %v399_v32  }
  0x1a   : > { %v524_v29 = vand.u32 4294901760, %v523_v27  ;;  %v530_v30 = vand.u32 4294901760, %v529_v28 }
  0x1c   : > { %525 = vmatprep.subr.mxu0 %v524_v29  ;;  %1003 = vperm.xlu0 %1767, %v395_v33  }
  0x1d   : > { %531 = vmatpush1.msra.mxu0 %v530_v30  ;;  %1014 = vperm.xlu1 %1768, %v393_v34  }
  0x1e   : > { %596 = vmatmul.mubr.f32.vlgmr.msra.gmra.mrb[0].mxu0 %v1858_v4  ;;  %604 = vmatprep.subr.mxu0 %v521_v22 }
  0x1f   : > { %607 = vmatpush1.msra.mxu0 %v527_v20  ;;  %670 = vmatprep.mubr.f32.mxu0 %v1777_v1 }
  0x20   : > { %680 = vmatprep.subr.mxu0 %v442_v15 }
  0x26   : > { %673 = vmatmul.mubr.f32.vlgmr.msra.gmra.mrb[0].mxu0 %v510_v7 }
  0x27   : > { %682 = vmatpush1.msra.mxu0 %v444_v16  ;;  %745 = vmatprep.mubr.f32.mxu0 %v1777_v1 }
  0x28   : > { %758 = vmatprep.subr.mxu0 %v522_v23 }
  0x2e   : > { %749 = vmatmul.mubr.f32.vlgmr.msra.gmra.mrb[0].mxu0 %v511_v12 }
  0x2f   : > { %762 = vmatpush1.msra.mxu0 %v528_v24  ;;  %825 = vmatprep.mubr.f32.mxu0 %v1777_v1 }
  0x30   : > { %834 = vmatprep.subr.mxu0 %v442_v15 }
  0x36   : > { %827 = vmatmul.mubr.f32.vlgmr.msra.gmra.mrb[0].mxu0 %v1858_v4 }
  0x37   : > { %836 = vmatpush1.msra.mxu0 %v444_v16  ;;  %899 = vmatprep.mubr.f32.mxu0 %v1777_v1 }
  0x3e   : > { %901 = vmatmul.mubr.f32.vlgmr.msra.gmra.mrb[0].mxu0 %v1858_v4  ;;  %v1930_v4 = vsel %vm420_vm4, 1.0, %v1777_v1 }
  0x3f   : > { %v423_v25 = vmul.f32 %v1930_v4, %v1926_v63 }
  0x87   : > { %v429_v35 = vpop.permute.xlu0 %428  ;;  %v917_v42 = vpop.permute.xlu1 %916 }
  0x8b   : > { %v910_v39 = vpop.permute.xlu0 %909  ;;  %v932_v48 = vpop.permute.xlu1 %931 }
  0x8f   : > { %v978_v50 = vpop.permute.xlu0 %977  ;;  %v926_v53 = vpop.permute.xlu1 %925 }
  0x93   : > { %v948_v56 = vpop.permute.xlu0 %947 }
  0x94   : > { %v955_v54 = vpop.permute.xlu1 %954 }
  0x97   : > { %v971_v59 = vpop.permute.xlu0 %970 }
  0x98   : > { %v993_v58 = vpop.permute.xlu1 %992 }
  0x9b   : > { %v1004_v62 = vpop.permute.xlu0 %1003 }
  0x9c   : > { %v1015_v61 = vpop.permute.xlu1 %1014 }
 0x111   : > { %v902_v36 = vpop.f32.mrb[0].mxu0 }
 0x112   : > { %v1729_v37 = vadd.f32 %v902_v36, %v429_v35  ;;  %v904_v38 = vpop.f32.mrb[1].mxu0 }
 0x113   : > { %v1730_v40 = vadd.f32 %v904_v38, %v429_v35 }
 0x114   : > { %v912_v41 = vmul.f32 %v1729_v37, %v910_v39 }
 0x115   : > { %v913_v43 = vmul.f32 %v1730_v40, %v910_v39 }
 0x116   : > { %v919_v44 = vadd.f32 %v917_v42, %v912_v41 }
 0x117   : > { %v920_v45 = vadd.f32 %v917_v42, %v913_v43 }
 0x118   : > { %v921_v46 = vmax.f32 %v919_v44, 0.0 }
 0x119   : > { %v922_v47 = vmax.f32 %v920_v45, 0.0 }
 0x11a   : > { %941 = vrot.lane.b32.xlu1 %v921_v46, %s1779_s27  ;;  %v934_v49 = vmul.f32 %v932_v48, %v921_v46  ;;  %v928_v6 = vmul.f32 %v926_v53, %v921_v46 }
 0x11b   : > { %962 = vrot.lane.b32.xlu0 %v922_v47, %s1780_s28  ;;  %v980_v51 = vmul.f32 %v978_v50, %v922_v47  ;;  %v957_v14 = vmul.f32 %v955_v54, %v922_v47 }
 0x11e   : > { %960 = vrot.lane.b32.xlu1 %v921_v46, %s1780_s28 }
 0x11f   : > { %936 = vrot.lane.b32.xlu0 %v934_v49, %s1781_s29 }
 0x122   : > { %982 = vrot.lane.b32.xlu1 %v980_v51, %s1781_s29 }
 0x123   : > { %986 = vrot.lane.b32.xlu0 %v922_v47, %s1779_s27 }
 0x126   : > { %1021 = vperm.xlu1 %1768, %v402_v52  }
 0x127   : > { %997 = vrot.lane.b32.xlu0 %v922_v47, %s1782_s12 }
 0x12a   : > { %1025 = vrot.lane.b32.xlu1 %v1876_v11, %s1781_s29 }
 0x12b   : > { %1008 = vrot.lane.b32.xlu0 %v922_v47, %s1783_s15 }
 0x12e   : > { %1035 = vrot.lane.b32.xlu1 %v1876_v11, %s1780_s28 }
 0x12f   : > { %1029 = vrot.lane.b32.xlu0 %v1876_v11, %s1779_s27 }
 0x133   : > { %1037 = vrot.lane.b32.xlu0 %v1874_v10, %s1780_s28 }
 0x137   : > { %1043 = vrot.lane.b32.xlu0 %v1874_v10, %s1781_s29 }
 0x13b   : > { %1047 = vrot.lane.b32.xlu0 %v1874_v10, %s1779_s27  ;;  %s388_s27 = scalar_lea.vmem %s1995_s10, %s1939_s16 }
 0x13f   : > { %1052 = vrot.lane.b32.xlu0 %v1874_v10, %s1782_s12 }
 0x143   : > { %1057 = vrot.lane.b32.xlu0 %v1874_v10, %s1783_s15 }
 0x18c   : > { %v942_v0 = vpop.permute.xlu1 %941 }
 0x18d   : > { %v963_v2 = vpop.permute.xlu0 %962  ;;  %v944_v3 = vmul.f32 %v1926_v63, %v942_v0 }
 0x18f   : > { %v950_v9 = vmul.f32 %v948_v56, %v944_v3 }
 0x190   : > { %v961_v5 = vpop.permute.xlu1 %960 }
 0x191   : > { %v965_v7 = vsel %vm964_vm5, %v961_v5, %v963_v2  ;;  %v937_v8 = vpop.permute.xlu0 %936 }
 0x192   : > { %v967_v12 = vmul.f32 %v1930_v4, %v965_v7  ;;  %v939_v13 = vadd.f32 %v937_v8, %v928_v6 }
 0x194   : > { %v951_v15 = vadd.f32 %v950_v9, %v939_v13  ;;  %v973_v17 = vmul.f32 %v971_v59, %v967_v12  ;;  %v983_v21 = vpop.permute.xlu1 %982 }
 0x195   : > { %v987_v16 = vpop.permute.xlu0 %986 }
 0x196   : > { %v958_v18 = vadd.f32 %v957_v14, %v951_v15  ;;  %v989_v20 = vmul.f32 %v1926_v63, %v987_v16 }
 0x198   : > { %v974_v19 = vadd.f32 %v973_v17, %v958_v18  ;;  %v995_v26 = vmul.f32 %v993_v58, %v989_v20 }
 0x199   : > { %v998_v22 = vpop.permute.xlu0 %997 }
 0x19a   : > { %v985_v23 = vadd.f32 %v983_v21, %v974_v19  ;;  %v1000_v24 = vmul.f32 %v1930_v4, %v998_v22 }
 0x19c   : > { %v996_v28 = vadd.f32 %v995_v26, %v985_v23  ;;  %v1006_v29 = vmul.f32 %v1004_v62, %v1000_v24 }
 0x19d   : > { %v1009_v27 = vpop.permute.xlu0 %1008 }
 0x19e   : > { %v1011_v30 = vmul.f32 %v1009_v27, %v423_v25  ;;  %v1007_v32 = vadd.f32 %v1006_v29, %v996_v28 }
 0x1a0   : > { %v1017_v31 = vmul.f32 %v1015_v61, %v1011_v30 }
 0x1a1   : > { %v1030_v45 = vpop.permute.xlu0 %1029 }
 0x1a2   : > { %v1018_v33 = vadd.f32 %v1017_v31, %v1007_v32  ;;  %v1032_v46 = vmul.f32 %v1926_v63, %v1030_v45 }
 0x1a5   : > { %v1022_v34 = vpop.permute.xlu1 %1021  ;;  %v1038_v49 = vpop.permute.xlu0 %1037 }
 0x1a6   : > { %v1024_v35 = vadd.f32 %v1022_v34, %v1018_v33 }
 0x1a8   : > { %v1073_v36 = vsel %vm1071_vm6, %v1024_v35, 0  ;;  %v1067_v37 = vsel %vm1063_vm7, %v1024_v35, 0.0  ;;  %1064 = vst.msk [vmem:[%s376_s19] sm:$0x3f] %vm1063_vm7, %v1024_v35 }
 0x1a9   : > { %v1076_v38 = vand.u32 4294901760, %v1073_v36  ;;  %1068 = vadd.xlane.f32.xlu1 %v1067_v37  ;;  %v1026_v43 = vpop.permute.xlu1 %1025  ;;  %v1044_v53 = vpop.permute.xlu0 %1043 }
 0x1aa   : > { %v1028_v44 = vadd.f32 %v1026_v43, %v1876_v11 }
 0x1ab   : > { %v1142_v39 = vsub.f32 %v1073_v36, %v1076_v38  ;;  %1700 = vmatpush3.xpose.msra.mxu1 %v1076_v38 }
 0x1ac   : > { %1704 = vmatprep.subr.mxu1 %v1777_v1  ;;  %v1033_v47 = vadd.f32 %v1032_v46, %v1028_v44 }
 0x1ad   : > { %v1143_v40 = vand.u32 4294901760, %v1142_v39  ;;  %v1036_v48 = vpop.permute.xlu1 %1035  ;;  %v1048_v55 = vpop.permute.xlu0 %1047 }
 0x1ae   : > { %v1039_v50 = vsel %vm964_vm5, %v1036_v48, %v1038_v49  ;;  %v1034_v51 = vadd.f32 %v1033_v47, %v1874_v10  ;;  %v1050_v56 = vmul.f32 %v1926_v63, %v1048_v55 }
 0x1af   : > { %v1144_v41 = vsub.f32 %v1142_v39, %v1143_v40  ;;  %v1041_v52 = vmul.f32 %v1930_v4, %v1039_v50 }
 0x1b1   : > { %v1145_v42 = vand.u32 4294901760, %v1144_v41  ;;  %v1042_v11 = vadd.f32 %v1041_v52, %v1034_v51  ;;  %v1053_v10 = vpop.permute.xlu0 %1052 }
 0x1b2   : > { %v1055_v58 = vmul.f32 %v1930_v4, %v1053_v10 }
 0x1b3   : > { %1702 = vmatmul.mubr.f32.vlgmr.msra.gmra.mrb[0].mxu1 %v1145_v42  ;;  %v1046_v54 = vadd.f32 %v1044_v53, %v1042_v11 }
 0x1b4   : > { %1705 = vmatpush3.xpose.msra.mxu1 %v1145_v42  ;;  %1706 = vmatprep.mubr.msk.f32.mxu1 %vm1784_vm2, %v1777_v1 }
 0x1b5   : > { %1709 = vmatprep.subr.mxu1 %v1777_v1  ;;  %v1051_v57 = vadd.f32 %v1050_v56, %v1046_v54  ;;  %v1058_v60 = vpop.permute.xlu0 %1057 }
 0x1b6   : > { %v1060_v61 = vmul.f32 %v1058_v60, %v423_v25 }
 0x1b7   : > { %v1056_v59 = vadd.f32 %v1055_v58, %v1051_v57 }
 0x1b9   : > { %v1061_v62 = vadd.f32 %v1060_v61, %v1056_v59 }
 0x1bb   : > { %1707 = vmatmul.mubr.f32.vlgmr.msra.gmra.mrb[0].mxu1 %v1076_v38  ;;  %v1062_v63 = vmul.f32 0.11111111, %v1061_v62 }
 0x1bc   : > { %1710 = vmatpush3.xpose.msra.mxu1 %v1142_v39  ;;  %1711 = vmatprep.mubr.msk.f32.mxu1 %vm1784_vm2, %v1777_v1 }
 0x1bd   : > { %1714 = vmatprep.subr.mxu1 %v1777_v1  ;;  %v1065_v0 = vmax.f32 %v1062_v63, 0.0 }
 0x1bf   : > { %1066 = vst.msk [vmem:[%s380_s21] sm:$0x3f] %vm1063_vm7, %v1065_v0 }
 0x1c3   : > { %1712 = vmatmul.mubr.f32.vlgmr.msra.gmra.mrb[0].mxu1 %v1142_v39 }
 0x1c4   : > { %1715 = vmatpush3.xpose.msra.mxu1 %v1076_v38  ;;  %1716 = vmatprep.mubr.msk.f32.mxu1 %vm1784_vm2, %v1777_v1 }
 0x1c5   : > { %1719 = vmatprep.subr.mxu1 %v1777_v1 }
 0x1cb   : > { %1717 = vmatmul.mubr.f32.vlgmr.msra.gmra.mrb[0].mxu1 %v1143_v40 }
 0x1cc   : > { %1720 = vmatpush3.xpose.msra.mxu1 %v1143_v40  ;;  %1721 = vmatprep.mubr.msk.f32.mxu1 %vm1784_vm2, %v1777_v1 }
 0x1cd   : > { %1724 = vmatprep.subr.mxu1 %v1777_v1 }
 0x1d3   : > { %1722 = vmatmul.mubr.f32.vlgmr.msra.gmra.mrb[0].mxu1 %v1076_v38 }
 0x1d4   : > { %1725 = vmatpush3.xpose.msra.mxu1 %v1076_v38  ;;  %1726 = vmatprep.mubr.msk.f32.mxu1 %vm1784_vm2, %v1777_v1 }
 0x1db   : > { %1727 = vmatmul.mubr.f32.vlgmr.msra.gmra.mrb[0].mxu1 %v1076_v38 }
 0x236   : > { %v1069_v2 = vpop.xlane.xlu1 %1068 }
 0x237   : > { %1522 = vst.msk [vmem:[%s384_s24] sm:$0x3f] %vm1521_vm8, %v1069_v2 }
 0x2ae   : > { %v1517_v3 = vpop.f32.mrb[0].mxu1 }
 0x2af   : > { %1524 = vst.msk [vmem:[%s388_s27] sm:$0x3f] %vm1523_vm9, %v1517_v3  ;;  %v1728_v4 = vpop.f32.mrb[1].mxu1 }
 0x2b0 PF: > { %s21_s13 = sadd.s32 1, %s1775_s13  }
 0x2b1   : > { %p18_p4 = scmp.ge.s32.totalorder %s21_s13, 4  }
 0x2b3   :  { %20 = sbr.rel (!%p18_p4) target bundleno = 1 (0x1), region = 114 }

</bundles_post_ra>
